<compile_context>
chip_gen: v5e
topology: v5e:2x2
jax: 0.10.0
libtpu: 0.0.40
codegen_flags: <defaults>
</compile_context>

<pallas_src>
import functools

import jax
import jax.numpy as jnp
from jax.experimental import pallas as pl
from jax.experimental.pallas import tpu as pltpu

_EPS = 1e-5


# ---------------------------------------------------------------------------
# Small helpers: capability probes + tile / spec selection
# ---------------------------------------------------------------------------
_BUFFERED_OK = None
_BF16_EXP = None


def _buffered_weight_specs_supported():
    """Probe once whether BlockSpec(pipeline_mode=pl.Buffered(1)) compiles/runs."""
    global _BUFFERED_OK
    if _BUFFERED_OK is not None:
        return _BUFFERED_OK
    try:
        def _copy(x_ref, o_ref):
            o_ref[...] = x_ref[...]

        spec = pl.BlockSpec((8, 128), lambda i: (0, 0),
                            pipeline_mode=pl.Buffered(1))
        fn = pl.pallas_call(
            _copy,
            out_shape=jax.ShapeDtypeStruct((8, 128), jnp.float32),
            grid=(2,),
            in_specs=[spec],
            out_specs=pl.BlockSpec((8, 128), lambda i: (0, 0)),
        )
        jax.block_until_ready(fn(jnp.zeros((8, 128), jnp.float32)))
        _BUFFERED_OK = True
    except Exception:
        _BUFFERED_OK = False
    return _BUFFERED_OK


def _bf16_exp_default():
    """bf16 EUP exp only on v6e / v7x (never v5e, which has no bf16 EUP)."""
    global _BF16_EXP
    if _BF16_EXP is not None:
        return _BF16_EXP
    try:
        kind = jax.devices()[0].device_kind.lower()
        _BF16_EXP = ("v6" in kind) or ("v7" in kind) or ("7x" in kind)
    except Exception:
        _BF16_EXP = False
    return _BF16_EXP


def _const_spec(shape):
    """BlockSpec for inputs whose block index is constant for every grid step
    (weights / biases): fetched once; single-buffered when supported."""
    index_map = lambda *_: (0,) * len(shape)
    if _buffered_weight_specs_supported():
        return pl.BlockSpec(shape, index_map, pipeline_mode=pl.Buffered(1))
    return pl.BlockSpec(shape, index_map)


def _pick_tile(n, candidates=(256, 128, 64, 32, 16, 8)):
    for t in candidates:
        if n % t == 0:
            return t
    return n


def _ffn_token_tile(T, D, H):
    # Cap Tt so f32 h/g temporaries (2*H/row) + x/out (2*D/row) + bf16 casts
    # stay under ~16 MiB -> fits v7x's 64 MiB VMEM with weights + buffering.
    budget = 16 * 1024 * 1024
    per_row = 4 * (2 * H + 2 * D) + 2 * (H + D)
    cap = max(8, budget // per_row)
    for t in (1024, 512, 256, 128, 64, 32, 16, 8):
        if t <= cap and T % t == 0 and T // t >= 2:
            return t
    return T


# ---------------------------------------------------------------------------
# Kernel A: LayerNorm + fused QKV projection  (one lane-dense matmul)
#   x (1, Tt, D)  ->  q/k/v (1, heads, Tt, dh) bf16, head-major, scale folded
# ---------------------------------------------------------------------------
def _qkv_proj_kernel(x_ref, gamma_ref, beta_ref, wqkv_ref,
                     q_ref, k_ref, v_ref, *, heads, dim_head, eps):
    x = x_ref[0]                                          # (Tt, D) f32
    mean = jnp.mean(x, axis=-1, keepdims=True)
    xc = x - mean
    var = jnp.mean(xc * xc, axis=-1, keepdims=True)       # two-pass variance
    xn = xc * jax.lax.rsqrt(var + eps) * gamma_ref[0] + beta_ref[0]

    # Single lane-dense MXU matmul: (Tt, D) @ (D, 3*inner) -> (Tt, 3*inner)
    qkv = jnp.dot(xn.astype(jnp.bfloat16), wqkv_ref[...],
                  preferred_element_type=jnp.float32).astype(jnp.bfloat16)

    inner = heads * dim_head
    for h in range(heads):                                # static column slices
        lo = h * dim_head
        q_ref[0, h] = qkv[:, lo:lo + dim_head]            # scale folded in W_q
        k_ref[0, h] = qkv[:, inner + lo:inner + lo + dim_head]
        v_ref[0, h] = qkv[:, 2 * inner + lo:2 * inner + lo + dim_head]


# ---------------------------------------------------------------------------
# Kernel B: flash attention + output projection + bias + residual
#   grid (B, q_tiles, kv_tiles); kv axis is the online-softmax reduction.
# ---------------------------------------------------------------------------
def _flash_attn_kernel(x_ref, q_ref, k_ref, v_ref, wo_ref, bo_ref, o_ref,
                       m_sc, l_sc, acc_sc, *, bf16_exp):
    ki = pl.program_id(2)

    @pl.when(ki == 0)
    def _():
        m_sc[...] = jnp.full_like(m_sc, -jnp.inf)
        l_sc[...] = jnp.zeros_like(l_sc)
        acc_sc[...] = jnp.zeros_like(acc_sc)

    q = q_ref[0]                                          # (h, Tq, dh) bf16
    k = k_ref[0]                                          # (h, Tk, dh) bf16
    v = v_ref[0]                                          # (h, Tk, dh) bf16

    # scores: (h, Tq, dh) x (h, Tk, dh) -> (h, Tq, Tk), f32 accumulation
    s = jax.lax.dot_general(q, k, (((2,), (2,)), ((0,), (0,))),
                            preferred_element_type=jnp.float32)

    m_prev = m_sc[...]
    m_new = jnp.maximum(m_prev, jnp.max(s, axis=-1, keepdims=True))
    alpha = jnp.exp(m_prev - m_new)                       # (h, Tq, 1) f32

    if bf16_exp:
        # v6e / v7x: bf16 EUP roughly doubles exp throughput in this phase.
        p = jnp.exp((s - m_new).astype(jnp.bfloat16))     # (h, Tq, Tk) bf16
        p_sum = jnp.sum(p.astype(jnp.float32), axis=-1, keepdims=True)
    else:
        p_f32 = jnp.exp(s - m_new)
        p_sum = jnp.sum(p_f32, axis=-1, keepdims=True)
        p = p_f32.astype(jnp.bfloat16)

    l_sc[...] = alpha * l_sc[...] + p_sum
    # p @ v: (h, Tq, Tk) @ (h, Tk, dh) -> (h, Tq, dh)
    pv = jax.lax.dot_general(p, v, (((2,), (1,)), ((0,), (0,))),
                             preferred_element_type=jnp.float32)
    acc_sc[...] = alpha * acc_sc[...] + pv
    m_sc[...] = m_new

    @pl.when(ki == pl.num_programs(2) - 1)
    def _():
        inv_l = pl.reciprocal(l_sc[...], approx=True)     # EUP slot
        o = acc_sc[...] * inv_l                           # (h, Tq, dh) f32
        # Relayout to (Tq, heads*dh) so the output projection is a single
        # inner-contraction matmul (not a dh-narrow head-batched one).
        o_cat = jnp.concatenate([o[h] for h in range(o.shape[0])], axis=-1)
        y = jnp.dot(o_cat.astype(jnp.bfloat16), wo_ref[...],
                    preferred_element_type=jnp.float32)
        y = y + bo_ref[0] + x_ref[0]                      # bias + fused residual
        o_ref[0] = y.astype(o_ref.dtype)


def attention_block(x, lp, *, heads, dim_head):
    """y = Attention(LayerNorm(x)) + x, split into an LN+QKV-proj kernel and a
    flash-attention kernel (q/k/v stream held in bf16 between them)."""
    B, N, D = x.shape
    inner = heads * dim_head

    # ---- kernel A: LN + QKV projection, token-tiled over (B, N) ----
    Ta = _pick_tile(N)
    qkv_shape = jax.ShapeDtypeStruct((B, heads, N, dim_head), jnp.bfloat16)
    qkv_kernel = functools.partial(_qkv_proj_kernel, heads=heads,
                                   dim_head=dim_head, eps=_EPS)
    q, k, v = pl.pallas_call(
        qkv_kernel,
        out_shape=(qkv_shape, qkv_shape, qkv_shape),
        grid_spec=pltpu.PrefetchScalarGridSpec(
            num_scalar_prefetch=0,
            grid=(B, N // Ta),
            in_specs=[
                pl.BlockSpec((1, Ta, D), lambda b, i: (b, i, 0)),
                _const_spec((1, D)),                       # ln gamma
                _const_spec((1, D)),                       # ln beta
                _const_spec((D, 3 * inner)),               # fused W_qkv (bf16)
            ],
            out_specs=tuple(
                pl.BlockSpec((1, heads, Ta, dim_head), lambda b, i: (b, 0, i, 0))
                for _ in range(3)),
        ),
        compiler_params=pltpu.CompilerParams(
            dimension_semantics=("parallel", "parallel")),
    )(x, lp['attn_gamma'], lp['attn_beta'], lp['w_qkv'])

    # ---- kernel B: flash attention + output projection + residual ----
    Tq = _pick_tile(N)
    Tk = _pick_tile(N)
    flash = functools.partial(_flash_attn_kernel, bf16_exp=_bf16_exp_default())
    return pl.pallas_call(
        flash,
        out_shape=jax.ShapeDtypeStruct((B, N, D), x.dtype),
        grid_spec=pltpu.PrefetchScalarGridSpec(
            num_scalar_prefetch=0,
            grid=(B, N // Tq, N // Tk),
            in_specs=[
                pl.BlockSpec((1, Tq, D), lambda b, qi, ki: (b, qi, 0)),  # residual x
                pl.BlockSpec((1, heads, Tq, dim_head),
                             lambda b, qi, ki: (b, 0, qi, 0)),           # q tile
                pl.BlockSpec((1, heads, Tk, dim_head),
                             lambda b, qi, ki: (b, 0, ki, 0)),           # k tile
                pl.BlockSpec((1, heads, Tk, dim_head),
                             lambda b, qi, ki: (b, 0, ki, 0)),           # v tile
                _const_spec((inner, D)),                                 # W_out (bf16)
                _const_spec((1, D)),                                     # b_out
            ],
            out_specs=pl.BlockSpec((1, Tq, D), lambda b, qi, ki: (b, qi, 0)),
            scratch_shapes=[
                pltpu.VMEM((heads, Tq, 1), jnp.float32),        # running max
                pltpu.VMEM((heads, Tq, 1), jnp.float32),        # running sum
                pltpu.VMEM((heads, Tq, dim_head), jnp.float32), # output acc
            ],
        ),
        compiler_params=pltpu.CompilerParams(
            dimension_semantics=("parallel", "parallel", "arbitrary")),
    )(x, q, k, v, lp['w_out'], lp['b_out'])


# ---------------------------------------------------------------------------
# FeedForward block: y = FF(LayerNorm(x)) + x, optionally fused final LayerNorm
# ---------------------------------------------------------------------------
def _ffn_kernel(x_ref, gamma_ref, beta_ref, w1_ref, b1_ref, w2_ref, b2_ref,
                fg_ref, fb_ref, o_ref, *, eps, final_ln):
    x = x_ref[...]                                        # (Tt, D) f32
    mean = jnp.mean(x, axis=-1, keepdims=True)
    xc = x - mean
    var = jnp.mean(xc * xc, axis=-1, keepdims=True)
    xn = xc * jax.lax.rsqrt(var + eps) * gamma_ref[0] + beta_ref[0]

    h = jnp.dot(xn.astype(jnp.bfloat16), w1_ref[...],
                preferred_element_type=jnp.float32) + b1_ref[0]
    # TODO(synk): PyTorch nn.GELU() is the exact erf form; tanh approximation
    # (max deviation ~3e-4) used since erf lowering in Mosaic is not guaranteed.
    c = 0.7978845608028654                                # sqrt(2/pi)
    g = 0.5 * h * (1.0 + jnp.tanh(c * (h + 0.044715 * h * h * h)))
    y = jnp.dot(g.astype(jnp.bfloat16), w2_ref[...],
                preferred_element_type=jnp.float32) + b2_ref[0]
    z = y + x                                             # fused residual
    if final_ln:                                          # fused final LayerNorm
        mu = jnp.mean(z, axis=-1, keepdims=True)
        zc = z - mu
        vz = jnp.mean(zc * zc, axis=-1, keepdims=True)
        z = zc * jax.lax.rsqrt(vz + eps) * fg_ref[0] + fb_ref[0]
    o_ref[...] = z.astype(o_ref.dtype)


def feedforward_block(x, lp, *, final_gamma=None, final_beta=None):
    B, N, D = x.shape
    H = lp['w1'].shape[1]
    T = B * N
    Tt = _ffn_token_tile(T, D, H)
    xt = x.reshape(T, D)

    final_ln = final_gamma is not None
    if not final_ln:
        final_gamma = jnp.ones((1, D), x.dtype)           # unused dummies
        final_beta = jnp.zeros((1, D), x.dtype)

    kernel = functools.partial(_ffn_kernel, eps=_EPS, final_ln=final_ln)
    out = pl.pallas_call(
        kernel,
        out_shape=jax.ShapeDtypeStruct((T, D), x.dtype),
        grid_spec=pltpu.PrefetchScalarGridSpec(
            num_scalar_prefetch=0,
            grid=(T // Tt,),
            in_specs=[
                pl.BlockSpec((Tt, D), lambda i: (i, 0)),   # x tokens
                _const_spec((1, D)),                       # ln gamma
                _const_spec((1, D)),                       # ln beta
                _const_spec((D, H)),                       # W1 (bf16)
                _const_spec((1, H)),                       # b1
                _const_spec((H, D)),                       # W2 (bf16)
                _const_spec((1, D)),                       # b2
                _const_spec((1, D)),                       # final ln gamma
                _const_spec((1, D)),                       # final ln beta
            ],
            out_specs=pl.BlockSpec((Tt, D), lambda i: (i, 0)),
        ),
        compiler_params=pltpu.CompilerParams(dimension_semantics=("parallel",)),
    )(xt, lp['ff_gamma'], lp['ff_beta'], lp['w1'], lp['b1'], lp['w2'], lp['b2'],
      final_gamma, final_beta)
    return out.reshape(B, N, D)


# ---------------------------------------------------------------------------
# Standalone LayerNorm (only used when depth == 0)
# ---------------------------------------------------------------------------
def _ln_kernel(x_ref, gamma_ref, beta_ref, o_ref, *, eps):
    x = x_ref[...]
    mean = jnp.mean(x, axis=-1, keepdims=True)
    xc = x - mean
    var = jnp.mean(xc * xc, axis=-1, keepdims=True)
    o_ref[...] = (xc * jax.lax.rsqrt(var + eps) * gamma_ref[0]
                  + beta_ref[0]).astype(o_ref.dtype)


def layernorm_block(x, gamma, beta):
    B, N, D = x.shape
    T = B * N
    Tt = _pick_tile(T)
    xt = x.reshape(T, D)
    out = pl.pallas_call(
        functools.partial(_ln_kernel, eps=_EPS),
        out_shape=jax.ShapeDtypeStruct((T, D), x.dtype),
        grid_spec=pltpu.PrefetchScalarGridSpec(
            num_scalar_prefetch=0,
            grid=(T // Tt,),
            in_specs=[pl.BlockSpec((Tt, D), lambda i: (i, 0)),
                      _const_spec((1, D)), _const_spec((1, D))],
            out_specs=pl.BlockSpec((Tt, D), lambda i: (i, 0)),
        ),
        compiler_params=pltpu.CompilerParams(dimension_semantics=("parallel",)),
    )(xt, gamma, beta)
    return out.reshape(B, N, D)


# ---------------------------------------------------------------------------
# One-time parameter preparation (hoisted out of the per-forward path)
# ---------------------------------------------------------------------------
def prepare_params(layers, norm_gamma, norm_beta, *, heads, dim_head):
    inner = heads * dim_head
    scale = dim_head ** -0.5
    prepped = []
    for lp in layers:
        wqkv = jnp.asarray(lp['w_qkv'])
        wqkv = wqkv.at[:, :inner].multiply(scale)          # fold 1/sqrt(dh) into W_q
        prepped.append(dict(
            attn_gamma=lp['attn_gamma'], attn_beta=lp['attn_beta'],
            w_qkv=wqkv.astype(jnp.bfloat16),
            w_out=lp['w_out'].astype(jnp.bfloat16),
            b_out=lp['b_out'],
            ff_gamma=lp['ff_gamma'], ff_beta=lp['ff_beta'],
            w1=lp['w1'].astype(jnp.bfloat16), b1=lp['b1'],
            w2=lp['w2'].astype(jnp.bfloat16), b2=lp['b2'],
        ))
    return dict(layers=prepped, norm_gamma=norm_gamma, norm_beta=norm_beta)


# ---------------------------------------------------------------------------
# Full Transformer forward (Pallas)
# ---------------------------------------------------------------------------
def transformer_forward(x, params, *, heads, dim_head):
    layers = params['layers']
    n = len(layers)
    for idx, lp in enumerate(layers):
        x = attention_block(x, lp, heads=heads, dim_head=dim_head)
        is_last = idx == n - 1
        x = feedforward_block(
            x, lp,
            final_gamma=params['norm_gamma'] if is_last else None,
            final_beta=params['norm_beta'] if is_last else None)
    if n == 0:
        x = layernorm_block(x, params['norm_gamma'], params['norm_beta'])
    return x


# ---------------------------------------------------------------------------
# Pure-JAX f32 reference (matches the PyTorch forward, dropout=0)
# ---------------------------------------------------------------------------
def _ln_ref(x, gamma, beta, eps=_EPS):
    mean = jnp.mean(x, axis=-1, keepdims=True)
    var = jnp.mean((x - mean) ** 2, axis=-1, keepdims=True)
    return (x - mean) / jnp.sqrt(var + eps) * gamma[0] + beta[0]


def _attention_ref(x, gamma, beta, w_qkv, w_out, b_out, *, heads, dim_head):
    B, N, D = x.shape
    inner = heads * dim_head
    scale = dim_head ** -0.5
    xn = _ln_ref(x, gamma, beta)
    qkv = xn @ w_qkv
    q, k, v = jnp.split(qkv, 3, axis=-1)

    def split_heads(t):  # 'b n (h d) -> b h n d'
        return t.reshape(B, N, heads, dim_head).transpose(0, 2, 1, 3)

    q, k, v = map(split_heads, (q, k, v))
    dots = jnp.einsum('bhnd,bhmd->bhnm', q, k) * scale
    attn = jax.nn.softmax(dots, axis=-1)
    out = jnp.einsum('bhnm,bhmd->bhnd', attn, v)
    out = out.transpose(0, 2, 1, 3).reshape(B, N, inner)
    return out @ w_out + b_out[0]


def _feedforward_ref(x, gamma, beta, w1, b1, w2, b2):
    xn = _ln_ref(x, gamma, beta)
    h = xn @ w1 + b1[0]
    g = jax.nn.gelu(h, approximate=False)    # PyTorch nn.GELU() (exact erf)
    return g @ w2 + b2[0]


def transformer_reference(x, layers, norm_gamma, norm_beta, *, heads, dim_head):
    for lp in layers:
        x = _attention_ref(x, lp['attn_gamma'], lp['attn_beta'], lp['w_qkv'],
                           lp['w_out'], lp['b_out'],
                           heads=heads, dim_head=dim_head) + x
        x = _feedforward_ref(x, lp['ff_gamma'], lp['ff_beta'], lp['w1'],
                             lp['b1'], lp['w2'], lp['b2']) + x
    return _ln_ref(x, norm_gamma, norm_beta)


if __name__ == "__main__":
    # Small shapes consistent with the module.
    B, N = 2, 8
    dim, depth, heads, dim_head, mlp_dim = 32, 2, 4, 16, 64
    inner = heads * dim_head

    key = jax.random.PRNGKey(0)
    key, kx = jax.random.split(key)
    x = jax.random.normal(kx, (B, N, dim), dtype=jnp.float32)

    layers = []
    for _ in range(depth):
        key, *ks = jax.random.split(key, 13)
        layers.append(dict(
            attn_gamma=1.0 + 0.1 * jax.random.normal(ks[0], (1, dim), jnp.float32),
            attn_beta=0.1 * jax.random.normal(ks[1], (1, dim), jnp.float32),
            w_qkv=0.05 * jax.random.normal(ks[2], (dim, 3 * inner), jnp.float32),
            w_out=0.05 * jax.random.normal(ks[3], (inner, dim), jnp.float32),
            b_out=0.05 * jax.random.normal(ks[4], (1, dim), jnp.float32),
            ff_gamma=1.0 + 0.1 * jax.random.normal(ks[5], (1, dim), jnp.float32),
            ff_beta=0.1 * jax.random.normal(ks[6], (1, dim), jnp.float32),
            w1=0.05 * jax.random.normal(ks[7], (dim, mlp_dim), jnp.float32),
            b1=0.05 * jax.random.normal(ks[8], (1, mlp_dim), jnp.float32),
            w2=0.05 * jax.random.normal(ks[9], (mlp_dim, dim), jnp.float32),
            b2=0.05 * jax.random.normal(ks[10], (1, dim), jnp.float32),
        ))
    key, kg, kb = jax.random.split(key, 3)
    norm_gamma = 1.0 + 0.1 * jax.random.normal(kg, (1, dim), jnp.float32)
    norm_beta = 0.1 * jax.random.normal(kb, (1, dim), jnp.float32)

    # Warm the capability probes (single-buffered weight specs, bf16 exp).
    _buffered_weight_specs_supported()
    _bf16_exp_default()

    # One-time parameter preparation, then a jitted Pallas forward.
    prep = prepare_params(layers, norm_gamma, norm_beta,
                          heads=heads, dim_head=dim_head)
    fwd = jax.jit(functools.partial(transformer_forward,
                                    heads=heads, dim_head=dim_head))
    y = jax.block_until_ready(fwd(x, prep))

    y_ref = transformer_reference(x, layers, norm_gamma, norm_beta,
                                  heads=heads, dim_head=dim_head)
    assert y.shape == (B, N, dim)
    # bf16 matmul inputs/qkv stream, (possibly) bf16 exp, approx reciprocal and
    # tanh-GELU -> loosened tolerance vs the f32/erf reference.
    assert jnp.allclose(y, y_ref, atol=4e-2, rtol=4e-2), (
        "mismatch vs reference: max abs diff = "
        f"{float(jnp.max(jnp.abs(y - y_ref)))}")

    print("KERNEL_OK")
</pallas_src>

<mosaic_0001>
module attributes {stable_mosaic.version = 11 : i64} {
  func.func @_copy(%arg0: i32, %arg1: memref<8x128xf32, #tpu.memory_space<vmem>>, %arg2: memref<8x128xf32, #tpu.memory_space<vmem>>) attributes {dimension_semantics = [#tpu.dimension_semantics<arbitrary>], iteration_bounds = array<i64: 2>, scalar_prefetch = 0 : i64, scratch_operands = 0 : i64, tpu.core_type = #tpu.core_type<tc>, window_params = [{pipeline_mode = #tpu.pipeline_mode<synchronous>, transform_indices = @transform_0, window_bounds = array<i64: 8, 128>}, {pipeline_mode = #tpu.pipeline_mode<synchronous>, transform_indices = @transform_1, window_bounds = array<i64: 8, 128>}]} {
    %c0 = arith.constant 0 : index
    %c0_0 = arith.constant 0 : index
    %0 = vector.load %arg1[%c0, %c0_0] : memref<8x128xf32, #tpu.memory_space<vmem>>, vector<8x128xf32>
    %c0_1 = arith.constant 0 : index
    %c0_2 = arith.constant 0 : index
    %1 = vector.load %arg2[%c0_1, %c0_2] : memref<8x128xf32, #tpu.memory_space<vmem>>, vector<8x128xf32>
    tpu.vector_store %arg2[%c0_1, %c0_2], %0 {strides = array<i32>} : memref<8x128xf32, #tpu.memory_space<vmem>>, vector<8x128xf32>,
    return
  }
  func.func @transform_0(%arg0: i32) -> (i32, i32) {
    %c0_i32 = arith.constant 0 : i32
    %c0_i32_0 = arith.constant 0 : i32
    %c0_i32_1 = arith.constant 0 : i32
    return %c0_i32, %c0_i32_0 : i32, i32
  }
  func.func @transform_1(%arg0: i32) -> (i32, i32) {
    %c0_i32 = arith.constant 0 : i32
    %c0_i32_0 = arith.constant 0 : i32
    %c0_i32_1 = arith.constant 0 : i32
    return %c0_i32, %c0_i32_0 : i32, i32
  }
}

module attributes {stable_mosaic.version = 11 : i64} {
  func.func @_ffn_kernel(%arg0: i32, %arg1: memref<8x32xf32, #tpu.memory_space<vmem>>, %arg2: memref<1x32xf32, #tpu.memory_space<vmem>>, %arg3: memref<1x32xf32, #tpu.memory_space<vmem>>, %arg4: memref<32x64xbf16, #tpu.memory_space<vmem>>, %arg5: memref<1x64xf32, #tpu.memory_space<vmem>>, %arg6: memref<64x32xbf16, #tpu.memory_space<vmem>>, %arg7: memref<1x32xf32, #tpu.memory_space<vmem>>, %arg8: memref<1x32xf32, #tpu.memory_space<vmem>>, %arg9: memref<1x32xf32, #tpu.memory_space<vmem>>, %arg10: memref<8x32xf32, #tpu.memory_space<vmem>>) attributes {dimension_semantics = [#tpu.dimension_semantics<parallel>], iteration_bounds = array<i64: 2>, scalar_prefetch = 0 : i64, scratch_operands = 0 : i64, tpu.core_type = #tpu.core_type<tc>, window_params = [{transform_indices = @transform_0, window_bounds = array<i64: 8, 32>}, {pipeline_mode = #tpu.pipeline_mode<synchronous>, transform_indices = @transform_1, window_bounds = array<i64: 1, 32>}, {pipeline_mode = #tpu.pipeline_mode<synchronous>, transform_indices = @transform_2, window_bounds = array<i64: 1, 32>}, {pipeline_mode = #tpu.pipeline_mode<synchronous>, transform_indices = @transform_3, window_bounds = array<i64: 32, 64>}, {pipeline_mode = #tpu.pipeline_mode<synchronous>, transform_indices = @transform_4, window_bounds = array<i64: 1, 64>}, {pipeline_mode = #tpu.pipeline_mode<synchronous>, transform_indices = @transform_5, window_bounds = array<i64: 64, 32>}, {pipeline_mode = #tpu.pipeline_mode<synchronous>, transform_indices = @transform_6, window_bounds = array<i64: 1, 32>}, {pipeline_mode = #tpu.pipeline_mode<synchronous>, transform_indices = @transform_7, window_bounds = array<i64: 1, 32>}, {pipeline_mode = #tpu.pipeline_mode<synchronous>, transform_indices = @transform_8, window_bounds = array<i64: 1, 32>}, {transform_indices = @transform_9, window_bounds = array<i64: 8, 32>}]} {
    %c0 = arith.constant 0 : index
    %c0_0 = arith.constant 0 : index
    %0 = vector.load %arg1[%c0, %c0_0] : memref<8x32xf32, #tpu.memory_space<vmem>>, vector<8x32xf32>
    %cst = arith.constant dense<0.000000e+00> : vector<8xf32>
    %1 = vector.multi_reduction <add>, %0, %cst [1] : vector<8x32xf32> to vector<8xf32>
    %2 = vector.shape_cast %1 : vector<8xf32> to vector<8x1xf32>
    %cst_1 = arith.constant 3.200000e+01 : f32
    %3 = vector.broadcast %cst_1 : f32 to vector<8x1xf32>
    %4 = arith.divf %2, %3 : vector<8x1xf32>
    %5 = vector.broadcast %4 : vector<8x1xf32> to vector<8x32xf32>
    %6 = arith.subf %0, %5 : vector<8x32xf32>
    %7 = arith.mulf %6, %6 : vector<8x32xf32>
    %cst_2 = arith.constant dense<0.000000e+00> : vector<8xf32>
    %8 = vector.multi_reduction <add>, %7, %cst_2 [1] : vector<8x32xf32> to vector<8xf32>
    %9 = vector.shape_cast %8 : vector<8xf32> to vector<8x1xf32>
    %cst_3 = arith.constant 3.200000e+01 : f32
    %10 = vector.broadcast %cst_3 : f32 to vector<8x1xf32>
    %11 = arith.divf %9, %10 : vector<8x1xf32>
    %cst_4 = arith.constant 9.99999974E-6 : f32
    %12 = vector.broadcast %cst_4 : f32 to vector<8x1xf32>
    %13 = arith.addf %11, %12 : vector<8x1xf32>
    %14 = math.rsqrt %13 : vector<8x1xf32>
    %15 = vector.broadcast %14 : vector<8x1xf32> to vector<8x32xf32>
    %16 = arith.mulf %6, %15 : vector<8x32xf32>
    %c0_5 = arith.constant 0 : index
    %c0_6 = arith.constant 0 : index
    %17 = vector.load %arg2[%c0_5, %c0_6] : memref<1x32xf32, #tpu.memory_space<vmem>>, vector<1x32xf32>
    %18 = vector.shape_cast %17 : vector<1x32xf32> to vector<32xf32>
    %19 = vector.shape_cast %18 : vector<32xf32> to vector<1x32xf32>
    %20 = vector.broadcast %19 : vector<1x32xf32> to vector<8x32xf32>
    %21 = arith.mulf %16, %20 : vector<8x32xf32>
    %c0_7 = arith.constant 0 : index
    %c0_8 = arith.constant 0 : index
    %22 = vector.load %arg3[%c0_7, %c0_8] : memref<1x32xf32, #tpu.memory_space<vmem>>, vector<1x32xf32>
    %23 = vector.shape_cast %22 : vector<1x32xf32> to vector<32xf32>
    %24 = vector.shape_cast %23 : vector<32xf32> to vector<1x32xf32>
    %25 = vector.broadcast %24 : vector<1x32xf32> to vector<8x32xf32>
    %26 = arith.addf %21, %25 : vector<8x32xf32>
    %27 = arith.truncf %26 : vector<8x32xf32> to vector<8x32xbf16>
    %c0_9 = arith.constant 0 : index
    %c0_10 = arith.constant 0 : index
    %28 = vector.load %arg4[%c0_9, %c0_10] : memref<32x64xbf16, #tpu.memory_space<vmem>>, vector<32x64xbf16>
    %cst_11 = arith.constant dense<0.000000e+00> : vector<8x64xf32>
    %29 = tpu.matmul %27, %28, %cst_11 {dimension_numbers = #tpu.dot_dimension_numbers<[1], [0], [0], [1], [0, 0, 1, 1], [], []>} : vector<8x32xbf16>, vector<32x64xbf16>, vector<8x64xf32> -> vector<8x64xf32>
    %c0_12 = arith.constant 0 : index
    %c0_13 = arith.constant 0 : index
    %30 = vector.load %arg5[%c0_12, %c0_13] : memref<1x64xf32, #tpu.memory_space<vmem>>, vector<1x64xf32>
    %31 = vector.shape_cast %30 : vector<1x64xf32> to vector<64xf32>
    %32 = vector.shape_cast %31 : vector<64xf32> to vector<1x64xf32>
    %33 = vector.broadcast %32 : vector<1x64xf32> to vector<8x64xf32>
    %34 = arith.addf %29, %33 : vector<8x64xf32>
    %cst_14 = arith.constant 5.000000e-01 : f32
    %35 = vector.broadcast %cst_14 : f32 to vector<8x64xf32>
    %36 = arith.mulf %35, %34 : vector<8x64xf32>
    %cst_15 = arith.constant 4.471500e-02 : f32
    %37 = vector.broadcast %cst_15 : f32 to vector<8x64xf32>
    %38 = arith.mulf %37, %34 : vector<8x64xf32>
    %39 = arith.mulf %38, %34 : vector<8x64xf32>
    %40 = arith.mulf %39, %34 : vector<8x64xf32>
    %41 = arith.addf %34, %40 : vector<8x64xf32>
    %cst_16 = arith.constant 0.797884583 : f32
    %42 = vector.broadcast %cst_16 : f32 to vector<8x64xf32>
    %43 = arith.mulf %42, %41 : vector<8x64xf32>
    %44 = math.tanh %43 : vector<8x64xf32>
    %cst_17 = arith.constant 1.000000e+00 : f32
    %45 = vector.broadcast %cst_17 : f32 to vector<8x64xf32>
    %46 = arith.addf %45, %44 : vector<8x64xf32>
    %47 = arith.mulf %36, %46 : vector<8x64xf32>
    %48 = arith.truncf %47 : vector<8x64xf32> to vector<8x64xbf16>
    %c0_18 = arith.constant 0 : index
    %c0_19 = arith.constant 0 : index
    %49 = vector.load %arg6[%c0_18, %c0_19] : memref<64x32xbf16, #tpu.memory_space<vmem>>, vector<64x32xbf16>
    %cst_20 = arith.constant dense<0.000000e+00> : vector<8x32xf32>
    %50 = tpu.matmul %48, %49, %cst_20 {dimension_numbers = #tpu.dot_dimension_numbers<[1], [0], [0], [1], [0, 0, 1, 1], [], []>} : vector<8x64xbf16>, vector<64x32xbf16>, vector<8x32xf32> -> vector<8x32xf32>
    %c0_21 = arith.constant 0 : index
    %c0_22 = arith.constant 0 : index
    %51 = vector.load %arg7[%c0_21, %c0_22] : memref<1x32xf32, #tpu.memory_space<vmem>>, vector<1x32xf32>
    %52 = vector.shape_cast %51 : vector<1x32xf32> to vector<32xf32>
    %53 = vector.shape_cast %52 : vector<32xf32> to vector<1x32xf32>
    %54 = vector.broadcast %53 : vector<1x32xf32> to vector<8x32xf32>
    %55 = arith.addf %50, %54 : vector<8x32xf32>
    %56 = arith.addf %55, %0 : vector<8x32xf32>
    %c0_23 = arith.constant 0 : index
    %c0_24 = arith.constant 0 : index
    %57 = vector.load %arg10[%c0_23, %c0_24] : memref<8x32xf32, #tpu.memory_space<vmem>>, vector<8x32xf32>
    tpu.vector_store %arg10[%c0_23, %c0_24], %56 {strides = array<i32>} : memref<8x32xf32, #tpu.memory_space<vmem>>, vector<8x32xf32>,
    return
  }
  func.func @transform_0(%arg0: i32) -> (i32, i32) {
    %c0_i32 = arith.constant 0 : i32
    %c0_i32_0 = arith.constant 0 : i32
    return %arg0, %c0_i32 : i32, i32
  }
  func.func @transform_1(%arg0: i32) -> (i32, i32) {
    %c0_i32 = arith.constant 0 : i32
    %c0_i32_0 = arith.constant 0 : i32
    %c0_i32_1 = arith.constant 0 : i32
    return %c0_i32, %c0_i32_0 : i32, i32
  }
  func.func @transform_2(%arg0: i32) -> (i32, i32) {
    %c0_i32 = arith.constant 0 : i32
    %c0_i32_0 = arith.constant 0 : i32
    %c0_i32_1 = arith.constant 0 : i32
    return %c0_i32, %c0_i32_0 : i32, i32
  }
  func.func @transform_3(%arg0: i32) -> (i32, i32) {
    %c0_i32 = arith.constant 0 : i32
    %c0_i32_0 = arith.constant 0 : i32
    %c0_i32_1 = arith.constant 0 : i32
    return %c0_i32, %c0_i32_0 : i32, i32
  }
  func.func @transform_4(%arg0: i32) -> (i32, i32) {
    %c0_i32 = arith.constant 0 : i32
    %c0_i32_0 = arith.constant 0 : i32
    %c0_i32_1 = arith.constant 0 : i32
    return %c0_i32, %c0_i32_0 : i32, i32
  }
  func.func @transform_5(%arg0: i32) -> (i32, i32) {
    %c0_i32 = arith.constant 0 : i32
    %c0_i32_0 = arith.constant 0 : i32
    %c0_i32_1 = arith.constant 0 : i32
    return %c0_i32, %c0_i32_0 : i32, i32
  }
  func.func @transform_6(%arg0: i32) -> (i32, i32) {
    %c0_i32 = arith.constant 0 : i32
    %c0_i32_0 = arith.constant 0 : i32
    %c0_i32_1 = arith.constant 0 : i32
    return %c0_i32, %c0_i32_0 : i32, i32
  }
  func.func @transform_7(%arg0: i32) -> (i32, i32) {
    %c0_i32 = arith.constant 0 : i32
    %c0_i32_0 = arith.constant 0 : i32
    %c0_i32_1 = arith.constant 0 : i32
    return %c0_i32, %c0_i32_0 : i32, i32
  }
  func.func @transform_8(%arg0: i32) -> (i32, i32) {
    %c0_i32 = arith.constant 0 : i32
    %c0_i32_0 = arith.constant 0 : i32
    %c0_i32_1 = arith.constant 0 : i32
    return %c0_i32, %c0_i32_0 : i32, i32
  }
  func.func @transform_9(%arg0: i32) -> (i32, i32) {
    %c0_i32 = arith.constant 0 : i32
    %c0_i32_0 = arith.constant 0 : i32
    return %arg0, %c0_i32 : i32, i32
  }
}

module attributes {stable_mosaic.version = 11 : i64} {
  func.func @_flash_attn_kernel(%arg0: i32, %arg1: i32, %arg2: i32, %arg3: memref<1x8x32xf32, #tpu.memory_space<vmem>>, %arg4: memref<1x4x8x16xbf16, #tpu.memory_space<vmem>>, %arg5: memref<1x4x8x16xbf16, #tpu.memory_space<vmem>>, %arg6: memref<1x4x8x16xbf16, #tpu.memory_space<vmem>>, %arg7: memref<64x32xbf16, #tpu.memory_space<vmem>>, %arg8: memref<1x32xf32, #tpu.memory_space<vmem>>, %arg9: memref<1x8x32xf32, #tpu.memory_space<vmem>>, %arg10: memref<4x8x1xf32, #tpu.memory_space<vmem>>, %arg11: memref<4x8x1xf32, #tpu.memory_space<vmem>>, %arg12: memref<4x8x16xf32, #tpu.memory_space<vmem>>) attributes {dimension_semantics = [#tpu.dimension_semantics<parallel>, #tpu.dimension_semantics<parallel>, #tpu.dimension_semantics<arbitrary>], iteration_bounds = array<i64: 2, 1, 1>, scalar_prefetch = 0 : i64, scratch_operands = 3 : i64, tpu.core_type = #tpu.core_type<tc>, window_params = [{transform_indices = @transform_0, window_bounds = array<i64: 1, 8, 32>}, {transform_indices = @transform_1, window_bounds = array<i64: 1, 4, 8, 16>}, {transform_indices = @transform_2, window_bounds = array<i64: 1, 4, 8, 16>}, {transform_indices = @transform_3, window_bounds = array<i64: 1, 4, 8, 16>}, {pipeline_mode = #tpu.pipeline_mode<synchronous>, transform_indices = @transform_4, window_bounds = array<i64: 64, 32>}, {pipeline_mode = #tpu.pipeline_mode<synchronous>, transform_indices = @transform_5, window_bounds = array<i64: 1, 32>}, {transform_indices = @transform_6, window_bounds = array<i64: 1, 8, 32>}]} {
    %c0_i32 = arith.constant 0 : i32
    %0 = arith.cmpi eq, %arg2, %c0_i32 : i32
    %1 = arith.extui %0 : i1 to i32
    %c0_i32_0 = arith.constant 0 : i32
    %2 = arith.cmpi ne, %1, %c0_i32_0 : i32
    scf.if %2 {
      %cst_35 = arith.constant 0xFF800000 : f32
      %36 = vector.broadcast %cst_35 : f32 to vector<4x8x1xf32>
      %c0_36 = arith.constant 0 : index
      %c0_37 = arith.constant 0 : index
      %c0_38 = arith.constant 0 : index
      %37 = vector.load %arg10[%c0_36, %c0_37, %c0_38] : memref<4x8x1xf32, #tpu.memory_space<vmem>>, vector<4x8x1xf32>
      tpu.vector_store %arg10[%c0_36, %c0_37, %c0_38], %36 {strides = array<i32>} : memref<4x8x1xf32, #tpu.memory_space<vmem>>, vector<4x8x1xf32>,
      %cst_39 = arith.constant 0.000000e+00 : f32
      %38 = vector.broadcast %cst_39 : f32 to vector<4x8x1xf32>
      %c0_40 = arith.constant 0 : index
      %c0_41 = arith.constant 0 : index
      %c0_42 = arith.constant 0 : index
      %39 = vector.load %arg11[%c0_40, %c0_41, %c0_42] : memref<4x8x1xf32, #tpu.memory_space<vmem>>, vector<4x8x1xf32>
      tpu.vector_store %arg11[%c0_40, %c0_41, %c0_42], %38 {strides = array<i32>} : memref<4x8x1xf32, #tpu.memory_space<vmem>>, vector<4x8x1xf32>,
      %cst_43 = arith.constant 0.000000e+00 : f32
      %40 = vector.broadcast %cst_43 : f32 to vector<4x8x16xf32>
      %c0_44 = arith.constant 0 : index
      %c0_45 = arith.constant 0 : index
      %c0_46 = arith.constant 0 : index
      %41 = vector.load %arg12[%c0_44, %c0_45, %c0_46] : memref<4x8x16xf32, #tpu.memory_space<vmem>>, vector<4x8x16xf32>
      tpu.vector_store %arg12[%c0_44, %c0_45, %c0_46], %40 {strides = array<i32>} : memref<4x8x16xf32, #tpu.memory_space<vmem>>, vector<4x8x16xf32>,
    } else {
    }
    %c0 = arith.constant 0 : index
    %c0_1 = arith.constant 0 : index
    %c0_2 = arith.constant 0 : index
    %c0_3 = arith.constant 0 : index
    %3 = vector.load %arg4[%c0, %c0_1, %c0_2, %c0_3] : memref<1x4x8x16xbf16, #tpu.memory_space<vmem>>, vector<1x4x8x16xbf16>
    %4 = vector.shape_cast %3 : vector<1x4x8x16xbf16> to vector<4x8x16xbf16>
    %c0_4 = arith.constant 0 : index
    %c0_5 = arith.constant 0 : index
    %c0_6 = arith.constant 0 : index
    %c0_7 = arith.constant 0 : index
    %5 = vector.load %arg5[%c0_4, %c0_5, %c0_6, %c0_7] : memref<1x4x8x16xbf16, #tpu.memory_space<vmem>>, vector<1x4x8x16xbf16>
    %6 = vector.shape_cast %5 : vector<1x4x8x16xbf16> to vector<4x8x16xbf16>
    %c0_8 = arith.constant 0 : index
    %c0_9 = arith.constant 0 : index
    %c0_10 = arith.constant 0 : index
    %c0_11 = arith.constant 0 : index
    %7 = vector.load %arg6[%c0_8, %c0_9, %c0_10, %c0_11] : memref<1x4x8x16xbf16, #tpu.memory_space<vmem>>, vector<1x4x8x16xbf16>
    %8 = vector.shape_cast %7 : vector<1x4x8x16xbf16> to vector<4x8x16xbf16>
    %cst = arith.constant dense<0.000000e+00> : vector<4x8x8xf32>
    %9 = tpu.matmul %4, %6, %cst {dimension_numbers = #tpu.dot_dimension_numbers<[2], [2], [1], [1], [0, 0, 0, 1, 1, 1], [0], [0]>} : vector<4x8x16xbf16>, vector<4x8x16xbf16>, vector<4x8x8xf32> -> vector<4x8x8xf32>
    %c0_12 = arith.constant 0 : index
    %c0_13 = arith.constant 0 : index
    %c0_14 = arith.constant 0 : index
    %10 = vector.load %arg10[%c0_12, %c0_13, %c0_14] : memref<4x8x1xf32, #tpu.memory_space<vmem>>, vector<4x8x1xf32>
    %cst_15 = arith.constant dense<0xFF800000> : vector<4x8xf32>
    %11 = vector.multi_reduction <maximumf>, %9, %cst_15 [2] : vector<4x8x8xf32> to vector<4x8xf32>
    %12 = vector.shape_cast %11 : vector<4x8xf32> to vector<4x8x1xf32>
    %13 = arith.maximumf %10, %12 : vector<4x8x1xf32>
    %14 = arith.subf %10, %13 : vector<4x8x1xf32>
    %15 = math.exp %14 : vector<4x8x1xf32>
    %16 = vector.broadcast %13 : vector<4x8x1xf32> to vector<4x8x8xf32>
    %17 = arith.subf %9, %16 : vector<4x8x8xf32>
    %18 = math.exp %17 : vector<4x8x8xf32>
    %cst_16 = arith.constant dense<0.000000e+00> : vector<4x8xf32>
    %19 = vector.multi_reduction <add>, %18, %cst_16 [2] : vector<4x8x8xf32> to vector<4x8xf32>
    %20 = vector.shape_cast %19 : vector<4x8xf32> to vector<4x8x1xf32>
    %21 = arith.truncf %18 : vector<4x8x8xf32> to vector<4x8x8xbf16>
    %c0_17 = arith.constant 0 : index
    %c0_18 = arith.constant 0 : index
    %c0_19 = arith.constant 0 : index
    %22 = vector.load %arg11[%c0_17, %c0_18, %c0_19] : memref<4x8x1xf32, #tpu.memory_space<vmem>>, vector<4x8x1xf32>
    %23 = arith.mulf %15, %22 : vector<4x8x1xf32>
    %24 = arith.addf %23, %20 : vector<4x8x1xf32>
    %c0_20 = arith.constant 0 : index
    %c0_21 = arith.constant 0 : index
    %c0_22 = arith.constant 0 : index
    %25 = vector.load %arg11[%c0_20, %c0_21, %c0_22] : memref<4x8x1xf32, #tpu.memory_space<vmem>>, vector<4x8x1xf32>
    tpu.vector_store %arg11[%c0_20, %c0_21, %c0_22], %24 {strides = array<i32>} : memref<4x8x1xf32, #tpu.memory_space<vmem>>, vector<4x8x1xf32>,
    %cst_23 = arith.constant dense<0.000000e+00> : vector<4x8x16xf32>
    %26 = tpu.matmul %21, %8, %cst_23 {dimension_numbers = #tpu.dot_dimension_numbers<[2], [1], [1], [2], [0, 0, 0, 1, 1, 2], [0], [0]>} : vector<4x8x8xbf16>, vector<4x8x16xbf16>, vector<4x8x16xf32> -> vector<4x8x16xf32>
    %c0_24 = arith.constant 0 : index
    %c0_25 = arith.constant 0 : index
    %c0_26 = arith.constant 0 : index
    %27 = vector.load %arg12[%c0_24, %c0_25, %c0_26] : memref<4x8x16xf32, #tpu.memory_space<vmem>>, vector<4x8x16xf32>
    %28 = vector.broadcast %15 : vector<4x8x1xf32> to vector<4x8x16xf32>
    %29 = arith.mulf %28, %27 : vector<4x8x16xf32>
    %30 = arith.addf %29, %26 : vector<4x8x16xf32>
    %c0_27 = arith.constant 0 : index
    %c0_28 = arith.constant 0 : index
    %c0_29 = arith.constant 0 : index
    %31 = vector.load %arg12[%c0_27, %c0_28, %c0_29] : memref<4x8x16xf32, #tpu.memory_space<vmem>>, vector<4x8x16xf32>
    tpu.vector_store %arg12[%c0_27, %c0_28, %c0_29], %30 {strides = array<i32>} : memref<4x8x16xf32, #tpu.memory_space<vmem>>, vector<4x8x16xf32>,
    %c0_30 = arith.constant 0 : index
    %c0_31 = arith.constant 0 : index
    %c0_32 = arith.constant 0 : index
    %32 = vector.load %arg10[%c0_30, %c0_31, %c0_32] : memref<4x8x1xf32, #tpu.memory_space<vmem>>, vector<4x8x1xf32>
    tpu.vector_store %arg10[%c0_30, %c0_31, %c0_32], %13 {strides = array<i32>} : memref<4x8x1xf32, #tpu.memory_space<vmem>>, vector<4x8x1xf32>,
    %c0_i32_33 = arith.constant 0 : i32
    %33 = arith.cmpi eq, %arg2, %c0_i32_33 : i32
    %34 = arith.extui %33 : i1 to i32
    %c0_i32_34 = arith.constant 0 : i32
    %35 = arith.cmpi ne, %34, %c0_i32_34 : i32
    scf.if %35 {
      %c0_35 = arith.constant 0 : index
      %c0_36 = arith.constant 0 : index
      %c0_37 = arith.constant 0 : index
      %36 = vector.load %arg11[%c0_35, %c0_36, %c0_37] : memref<4x8x1xf32, #tpu.memory_space<vmem>>, vector<4x8x1xf32>
      %37 = tpu.reciprocal %36 {approx = true} : vector<4x8x1xf32> -> vector<4x8x1xf32>
      %c0_38 = arith.constant 0 : index
      %c0_39 = arith.constant 0 : index
      %c0_40 = arith.constant 0 : index
      %38 = vector.load %arg12[%c0_38, %c0_39, %c0_40] : memref<4x8x16xf32, #tpu.memory_space<vmem>>, vector<4x8x16xf32>
      %39 = vector.broadcast %37 : vector<4x8x1xf32> to vector<4x8x16xf32>
      %40 = arith.mulf %38, %39 : vector<4x8x16xf32>
      %41 = vector.extract_strided_slice %40 {offsets = [0, 0, 0], sizes = [1, 8, 16], strides = [1, 1, 1]} : vector<4x8x16xf32> to vector<1x8x16xf32>
      %42 = vector.shape_cast %41 : vector<1x8x16xf32> to vector<8x16xf32>
      %43 = vector.extract_strided_slice %40 {offsets = [1, 0, 0], sizes = [1, 8, 16], strides = [1, 1, 1]} : vector<4x8x16xf32> to vector<1x8x16xf32>
      %44 = vector.shape_cast %43 : vector<1x8x16xf32> to vector<8x16xf32>
      %45 = vector.extract_strided_slice %40 {offsets = [2, 0, 0], sizes = [1, 8, 16], strides = [1, 1, 1]} : vector<4x8x16xf32> to vector<1x8x16xf32>
      %46 = vector.shape_cast %45 : vector<1x8x16xf32> to vector<8x16xf32>
      %47 = vector.extract_strided_slice %40 {offsets = [3, 0, 0], sizes = [1, 8, 16], strides = [1, 1, 1]} : vector<4x8x16xf32> to vector<1x8x16xf32>
      %48 = vector.shape_cast %47 : vector<1x8x16xf32> to vector<8x16xf32>
      %49 = tpu.concatenate %42, %44, %46, %48 in 1 : vector<8x16xf32>, vector<8x16xf32>, vector<8x16xf32>, vector<8x16xf32> -> vector<8x64xf32>
      %50 = arith.truncf %49 : vector<8x64xf32> to vector<8x64xbf16>
      %c0_41 = arith.constant 0 : index
      %c0_42 = arith.constant 0 : index
      %51 = vector.load %arg7[%c0_41, %c0_42] : memref<64x32xbf16, #tpu.memory_space<vmem>>, vector<64x32xbf16>
      %cst_43 = arith.constant dense<0.000000e+00> : vector<8x32xf32>
      %52 = tpu.matmul %50, %51, %cst_43 {dimension_numbers = #tpu.dot_dimension_numbers<[1], [0], [0], [1], [0, 0, 1, 1], [], []>} : vector<8x64xbf16>, vector<64x32xbf16>, vector<8x32xf32> -> vector<8x32xf32>
      %c0_44 = arith.constant 0 : index
      %c0_45 = arith.constant 0 : index
      %53 = vector.load %arg8[%c0_44, %c0_45] : memref<1x32xf32, #tpu.memory_space<vmem>>, vector<1x32xf32>
      %54 = vector.shape_cast %53 : vector<1x32xf32> to vector<32xf32>
      %55 = vector.shape_cast %54 : vector<32xf32> to vector<1x32xf32>
      %56 = vector.broadcast %55 : vector<1x32xf32> to vector<8x32xf32>
      %57 = arith.addf %52, %56 : vector<8x32xf32>
      %c0_46 = arith.constant 0 : index
      %c0_47 = arith.constant 0 : index
      %c0_48 = arith.constant 0 : index
      %58 = vector.load %arg3[%c0_46, %c0_47, %c0_48] : memref<1x8x32xf32, #tpu.memory_space<vmem>>, vector<1x8x32xf32>
      %59 = vector.shape_cast %58 : vector<1x8x32xf32> to vector<8x32xf32>
      %60 = arith.addf %57, %59 : vector<8x32xf32>
      %c0_49 = arith.constant 0 : index
      %c0_50 = arith.constant 0 : index
      %c0_51 = arith.constant 0 : index
      %61 = vector.load %arg9[%c0_49, %c0_50, %c0_51] : memref<1x8x32xf32, #tpu.memory_space<vmem>>, vector<1x8x32xf32>
      %62 = vector.shape_cast %61 : vector<1x8x32xf32> to vector<8x32xf32>
      %63 = vector.shape_cast %60 : vector<8x32xf32> to vector<1x8x32xf32>
      tpu.vector_store %arg9[%c0_49, %c0_50, %c0_51], %63 {strides = array<i32>} : memref<1x8x32xf32, #tpu.memory_space<vmem>>, vector<1x8x32xf32>,
    } else {
    }
    return
  }
  func.func @transform_0(%arg0: i32, %arg1: i32, %arg2: i32) -> (i32, i32, i32) {
    %c0_i32 = arith.constant 0 : i32
    %c0_i32_0 = arith.constant 0 : i32
    return %arg0, %arg1, %c0_i32 : i32, i32, i32
  }
  func.func @transform_1(%arg0: i32, %arg1: i32, %arg2: i32) -> (i32, i32, i32, i32) {
    %c0_i32 = arith.constant 0 : i32
    %c0_i32_0 = arith.constant 0 : i32
    %c0_i32_1 = arith.constant 0 : i32
    return %arg0, %c0_i32, %arg1, %c0_i32_0 : i32, i32, i32, i32
  }
  func.func @transform_2(%arg0: i32, %arg1: i32, %arg2: i32) -> (i32, i32, i32, i32) {
    %c0_i32 = arith.constant 0 : i32
    %c0_i32_0 = arith.constant 0 : i32
    %c0_i32_1 = arith.constant 0 : i32
    return %arg0, %c0_i32, %arg2, %c0_i32_0 : i32, i32, i32, i32
  }
  func.func @transform_3(%arg0: i32, %arg1: i32, %arg2: i32) -> (i32, i32, i32, i32) {
    %c0_i32 = arith.constant 0 : i32
    %c0_i32_0 = arith.constant 0 : i32
    %c0_i32_1 = arith.constant 0 : i32
    return %arg0, %c0_i32, %arg2, %c0_i32_0 : i32, i32, i32, i32
  }
  func.func @transform_4(%arg0: i32, %arg1: i32, %arg2: i32) -> (i32, i32) {
    %c0_i32 = arith.constant 0 : i32
    %c0_i32_0 = arith.constant 0 : i32
    %c0_i32_1 = arith.constant 0 : i32
    return %c0_i32, %c0_i32_0 : i32, i32
  }
  func.func @transform_5(%arg0: i32, %arg1: i32, %arg2: i32) -> (i32, i32) {
    %c0_i32 = arith.constant 0 : i32
    %c0_i32_0 = arith.constant 0 : i32
    %c0_i32_1 = arith.constant 0 : i32
    return %c0_i32, %c0_i32_0 : i32, i32
  }
  func.func @transform_6(%arg0: i32, %arg1: i32, %arg2: i32) -> (i32, i32, i32) {
    %c0_i32 = arith.constant 0 : i32
    %c0_i32_0 = arith.constant 0 : i32
    return %arg0, %arg1, %c0_i32 : i32, i32, i32
  }
}

module attributes {stable_mosaic.version = 11 : i64} {
  func.func @_qkv_proj_kernel(%arg0: i32, %arg1: i32, %arg2: memref<1x8x32xf32, #tpu.memory_space<vmem>>, %arg3: memref<1x32xf32, #tpu.memory_space<vmem>>, %arg4: memref<1x32xf32, #tpu.memory_space<vmem>>, %arg5: memref<32x192xbf16, #tpu.memory_space<vmem>>, %arg6: memref<1x4x8x16xbf16, #tpu.memory_space<vmem>>, %arg7: memref<1x4x8x16xbf16, #tpu.memory_space<vmem>>, %arg8: memref<1x4x8x16xbf16, #tpu.memory_space<vmem>>) attributes {dimension_semantics = [#tpu.dimension_semantics<parallel>, #tpu.dimension_semantics<parallel>], iteration_bounds = array<i64: 2, 1>, scalar_prefetch = 0 : i64, scratch_operands = 0 : i64, tpu.core_type = #tpu.core_type<tc>, window_params = [{transform_indices = @transform_0, window_bounds = array<i64: 1, 8, 32>}, {pipeline_mode = #tpu.pipeline_mode<synchronous>, transform_indices = @transform_1, window_bounds = array<i64: 1, 32>}, {pipeline_mode = #tpu.pipeline_mode<synchronous>, transform_indices = @transform_2, window_bounds = array<i64: 1, 32>}, {pipeline_mode = #tpu.pipeline_mode<synchronous>, transform_indices = @transform_3, window_bounds = array<i64: 32, 192>}, {transform_indices = @transform_4, window_bounds = array<i64: 1, 4, 8, 16>}, {transform_indices = @transform_5, window_bounds = array<i64: 1, 4, 8, 16>}, {transform_indices = @transform_6, window_bounds = array<i64: 1, 4, 8, 16>}]} {
    %c0 = arith.constant 0 : index
    %c0_0 = arith.constant 0 : index
    %c0_1 = arith.constant 0 : index
    %0 = vector.load %arg2[%c0, %c0_0, %c0_1] : memref<1x8x32xf32, #tpu.memory_space<vmem>>, vector<1x8x32xf32>
    %1 = vector.shape_cast %0 : vector<1x8x32xf32> to vector<8x32xf32>
    %cst = arith.constant dense<0.000000e+00> : vector<8xf32>
    %2 = vector.multi_reduction <add>, %1, %cst [1] : vector<8x32xf32> to vector<8xf32>
    %3 = vector.shape_cast %2 : vector<8xf32> to vector<8x1xf32>
    %cst_2 = arith.constant 3.200000e+01 : f32
    %4 = vector.broadcast %cst_2 : f32 to vector<8x1xf32>
    %5 = arith.divf %3, %4 : vector<8x1xf32>
    %6 = vector.broadcast %5 : vector<8x1xf32> to vector<8x32xf32>
    %7 = arith.subf %1, %6 : vector<8x32xf32>
    %8 = arith.mulf %7, %7 : vector<8x32xf32>
    %cst_3 = arith.constant dense<0.000000e+00> : vector<8xf32>
    %9 = vector.multi_reduction <add>, %8, %cst_3 [1] : vector<8x32xf32> to vector<8xf32>
    %10 = vector.shape_cast %9 : vector<8xf32> to vector<8x1xf32>
    %cst_4 = arith.constant 3.200000e+01 : f32
    %11 = vector.broadcast %cst_4 : f32 to vector<8x1xf32>
    %12 = arith.divf %10, %11 : vector<8x1xf32>
    %cst_5 = arith.constant 9.99999974E-6 : f32
    %13 = vector.broadcast %cst_5 : f32 to vector<8x1xf32>
    %14 = arith.addf %12, %13 : vector<8x1xf32>
    %15 = math.rsqrt %14 : vector<8x1xf32>
    %16 = vector.broadcast %15 : vector<8x1xf32> to vector<8x32xf32>
    %17 = arith.mulf %7, %16 : vector<8x32xf32>
    %c0_6 = arith.constant 0 : index
    %c0_7 = arith.constant 0 : index
    %18 = vector.load %arg3[%c0_6, %c0_7] : memref<1x32xf32, #tpu.memory_space<vmem>>, vector<1x32xf32>
    %19 = vector.shape_cast %18 : vector<1x32xf32> to vector<32xf32>
    %20 = vector.shape_cast %19 : vector<32xf32> to vector<1x32xf32>
    %21 = vector.broadcast %20 : vector<1x32xf32> to vector<8x32xf32>
    %22 = arith.mulf %17, %21 : vector<8x32xf32>
    %c0_8 = arith.constant 0 : index
    %c0_9 = arith.constant 0 : index
    %23 = vector.load %arg4[%c0_8, %c0_9] : memref<1x32xf32, #tpu.memory_space<vmem>>, vector<1x32xf32>
    %24 = vector.shape_cast %23 : vector<1x32xf32> to vector<32xf32>
    %25 = vector.shape_cast %24 : vector<32xf32> to vector<1x32xf32>
    %26 = vector.broadcast %25 : vector<1x32xf32> to vector<8x32xf32>
    %27 = arith.addf %22, %26 : vector<8x32xf32>
    %28 = arith.truncf %27 : vector<8x32xf32> to vector<8x32xbf16>
    %c0_10 = arith.constant 0 : index
    %c0_11 = arith.constant 0 : index
    %29 = vector.load %arg5[%c0_10, %c0_11] : memref<32x192xbf16, #tpu.memory_space<vmem>>, vector<32x192xbf16>
    %cst_12 = arith.constant dense<0.000000e+00> : vector<8x192xf32>
    %30 = tpu.matmul %28, %29, %cst_12 {dimension_numbers = #tpu.dot_dimension_numbers<[1], [0], [0], [1], [0, 0, 1, 1], [], []>} : vector<8x32xbf16>, vector<32x192xbf16>, vector<8x192xf32> -> vector<8x192xf32>
    %31 = arith.truncf %30 : vector<8x192xf32> to vector<8x192xbf16>
    %32 = vector.extract_strided_slice %31 {offsets = [0, 0], sizes = [8, 16], strides = [1, 1]} : vector<8x192xbf16> to vector<8x16xbf16>
    %c0_13 = arith.constant 0 : index
    %c0_14 = arith.constant 0 : index
    %c0_15 = arith.constant 0 : index
    %c0_16 = arith.constant 0 : index
    %33 = vector.load %arg6[%c0_13, %c0_14, %c0_15, %c0_16] : memref<1x4x8x16xbf16, #tpu.memory_space<vmem>>, vector<1x1x8x16xbf16>
    %34 = vector.shape_cast %33 : vector<1x1x8x16xbf16> to vector<8x16xbf16>
    %35 = vector.shape_cast %32 : vector<8x16xbf16> to vector<1x1x8x16xbf16>
    tpu.vector_store %arg6[%c0_13, %c0_14, %c0_15, %c0_16], %35 {strides = array<i32>} : memref<1x4x8x16xbf16, #tpu.memory_space<vmem>>, vector<1x1x8x16xbf16>,
    %36 = vector.extract_strided_slice %31 {offsets = [0, 64], sizes = [8, 16], strides = [1, 1]} : vector<8x192xbf16> to vector<8x16xbf16>
    %c0_17 = arith.constant 0 : index
    %c0_18 = arith.constant 0 : index
    %c0_19 = arith.constant 0 : index
    %c0_20 = arith.constant 0 : index
    %37 = vector.load %arg7[%c0_17, %c0_18, %c0_19, %c0_20] : memref<1x4x8x16xbf16, #tpu.memory_space<vmem>>, vector<1x1x8x16xbf16>
    %38 = vector.shape_cast %37 : vector<1x1x8x16xbf16> to vector<8x16xbf16>
    %39 = vector.shape_cast %36 : vector<8x16xbf16> to vector<1x1x8x16xbf16>
    tpu.vector_store %arg7[%c0_17, %c0_18, %c0_19, %c0_20], %39 {strides = array<i32>} : memref<1x4x8x16xbf16, #tpu.memory_space<vmem>>, vector<1x1x8x16xbf16>,
    %40 = vector.extract_strided_slice %31 {offsets = [0, 128], sizes = [8, 16], strides = [1, 1]} : vector<8x192xbf16> to vector<8x16xbf16>
    %c0_21 = arith.constant 0 : index
    %c0_22 = arith.constant 0 : index
    %c0_23 = arith.constant 0 : index
    %c0_24 = arith.constant 0 : index
    %41 = vector.load %arg8[%c0_21, %c0_22, %c0_23, %c0_24] : memref<1x4x8x16xbf16, #tpu.memory_space<vmem>>, vector<1x1x8x16xbf16>
    %42 = vector.shape_cast %41 : vector<1x1x8x16xbf16> to vector<8x16xbf16>
    %43 = vector.shape_cast %40 : vector<8x16xbf16> to vector<1x1x8x16xbf16>
    tpu.vector_store %arg8[%c0_21, %c0_22, %c0_23, %c0_24], %43 {strides = array<i32>} : memref<1x4x8x16xbf16, #tpu.memory_space<vmem>>, vector<1x1x8x16xbf16>,
    %44 = vector.extract_strided_slice %31 {offsets = [0, 16], sizes = [8, 16], strides = [1, 1]} : vector<8x192xbf16> to vector<8x16xbf16>
    %c0_25 = arith.constant 0 : index
    %c1 = arith.constant 1 : index
    %c0_26 = arith.constant 0 : index
    %c0_27 = arith.constant 0 : index
    %45 = vector.load %arg6[%c0_25, %c1, %c0_26, %c0_27] : memref<1x4x8x16xbf16, #tpu.memory_space<vmem>>, vector<1x1x8x16xbf16>
    %46 = vector.shape_cast %45 : vector<1x1x8x16xbf16> to vector<8x16xbf16>
    %47 = vector.shape_cast %44 : vector<8x16xbf16> to vector<1x1x8x16xbf16>
    tpu.vector_store %arg6[%c0_25, %c1, %c0_26, %c0_27], %47 {strides = array<i32>} : memref<1x4x8x16xbf16, #tpu.memory_space<vmem>>, vector<1x1x8x16xbf16>,
    %48 = vector.extract_strided_slice %31 {offsets = [0, 80], sizes = [8, 16], strides = [1, 1]} : vector<8x192xbf16> to vector<8x16xbf16>
    %c0_28 = arith.constant 0 : index
    %c1_29 = arith.constant 1 : index
    %c0_30 = arith.constant 0 : index
    %c0_31 = arith.constant 0 : index
    %49 = vector.load %arg7[%c0_28, %c1_29, %c0_30, %c0_31] : memref<1x4x8x16xbf16, #tpu.memory_space<vmem>>, vector<1x1x8x16xbf16>
    %50 = vector.shape_cast %49 : vector<1x1x8x16xbf16> to vector<8x16xbf16>
    %51 = vector.shape_cast %48 : vector<8x16xbf16> to vector<1x1x8x16xbf16>
    tpu.vector_store %arg7[%c0_28, %c1_29, %c0_30, %c0_31], %51 {strides = array<i32>} : memref<1x4x8x16xbf16, #tpu.memory_space<vmem>>, vector<1x1x8x16xbf16>,
    %52 = vector.extract_strided_slice %31 {offsets = [0, 144], sizes = [8, 16], strides = [1, 1]} : vector<8x192xbf16> to vector<8x16xbf16>
    %c0_32 = arith.constant 0 : index
    %c1_33 = arith.constant 1 : index
    %c0_34 = arith.constant 0 : index
    %c0_35 = arith.constant 0 : index
    %53 = vector.load %arg8[%c0_32, %c1_33, %c0_34, %c0_35] : memref<1x4x8x16xbf16, #tpu.memory_space<vmem>>, vector<1x1x8x16xbf16>
    %54 = vector.shape_cast %53 : vector<1x1x8x16xbf16> to vector<8x16xbf16>
    %55 = vector.shape_cast %52 : vector<8x16xbf16> to vector<1x1x8x16xbf16>
    tpu.vector_store %arg8[%c0_32, %c1_33, %c0_34, %c0_35], %55 {strides = array<i32>} : memref<1x4x8x16xbf16, #tpu.memory_space<vmem>>, vector<1x1x8x16xbf16>,
    %56 = vector.extract_strided_slice %31 {offsets = [0, 32], sizes = [8, 16], strides = [1, 1]} : vector<8x192xbf16> to vector<8x16xbf16>
    %c0_36 = arith.constant 0 : index
    %c2 = arith.constant 2 : index
    %c0_37 = arith.constant 0 : index
    %c0_38 = arith.constant 0 : index
    %57 = vector.load %arg6[%c0_36, %c2, %c0_37, %c0_38] : memref<1x4x8x16xbf16, #tpu.memory_space<vmem>>, vector<1x1x8x16xbf16>
    %58 = vector.shape_cast %57 : vector<1x1x8x16xbf16> to vector<8x16xbf16>
    %59 = vector.shape_cast %56 : vector<8x16xbf16> to vector<1x1x8x16xbf16>
    tpu.vector_store %arg6[%c0_36, %c2, %c0_37, %c0_38], %59 {strides = array<i32>} : memref<1x4x8x16xbf16, #tpu.memory_space<vmem>>, vector<1x1x8x16xbf16>,
    %60 = vector.extract_strided_slice %31 {offsets = [0, 96], sizes = [8, 16], strides = [1, 1]} : vector<8x192xbf16> to vector<8x16xbf16>
    %c0_39 = arith.constant 0 : index
    %c2_40 = arith.constant 2 : index
    %c0_41 = arith.constant 0 : index
    %c0_42 = arith.constant 0 : index
    %61 = vector.load %arg7[%c0_39, %c2_40, %c0_41, %c0_42] : memref<1x4x8x16xbf16, #tpu.memory_space<vmem>>, vector<1x1x8x16xbf16>
    %62 = vector.shape_cast %61 : vector<1x1x8x16xbf16> to vector<8x16xbf16>
    %63 = vector.shape_cast %60 : vector<8x16xbf16> to vector<1x1x8x16xbf16>
    tpu.vector_store %arg7[%c0_39, %c2_40, %c0_41, %c0_42], %63 {strides = array<i32>} : memref<1x4x8x16xbf16, #tpu.memory_space<vmem>>, vector<1x1x8x16xbf16>,
    %64 = vector.extract_strided_slice %31 {offsets = [0, 160], sizes = [8, 16], strides = [1, 1]} : vector<8x192xbf16> to vector<8x16xbf16>
    %c0_43 = arith.constant 0 : index
    %c2_44 = arith.constant 2 : index
    %c0_45 = arith.constant 0 : index
    %c0_46 = arith.constant 0 : index
    %65 = vector.load %arg8[%c0_43, %c2_44, %c0_45, %c0_46] : memref<1x4x8x16xbf16, #tpu.memory_space<vmem>>, vector<1x1x8x16xbf16>
    %66 = vector.shape_cast %65 : vector<1x1x8x16xbf16> to vector<8x16xbf16>
    %67 = vector.shape_cast %64 : vector<8x16xbf16> to vector<1x1x8x16xbf16>
    tpu.vector_store %arg8[%c0_43, %c2_44, %c0_45, %c0_46], %67 {strides = array<i32>} : memref<1x4x8x16xbf16, #tpu.memory_space<vmem>>, vector<1x1x8x16xbf16>,
    %68 = vector.extract_strided_slice %31 {offsets = [0, 48], sizes = [8, 16], strides = [1, 1]} : vector<8x192xbf16> to vector<8x16xbf16>
    %c0_47 = arith.constant 0 : index
    %c3 = arith.constant 3 : index
    %c0_48 = arith.constant 0 : index
    %c0_49 = arith.constant 0 : index
    %69 = vector.load %arg6[%c0_47, %c3, %c0_48, %c0_49] : memref<1x4x8x16xbf16, #tpu.memory_space<vmem>>, vector<1x1x8x16xbf16>
    %70 = vector.shape_cast %69 : vector<1x1x8x16xbf16> to vector<8x16xbf16>
    %71 = vector.shape_cast %68 : vector<8x16xbf16> to vector<1x1x8x16xbf16>
    tpu.vector_store %arg6[%c0_47, %c3, %c0_48, %c0_49], %71 {strides = array<i32>} : memref<1x4x8x16xbf16, #tpu.memory_space<vmem>>, vector<1x1x8x16xbf16>,
    %72 = vector.extract_strided_slice %31 {offsets = [0, 112], sizes = [8, 16], strides = [1, 1]} : vector<8x192xbf16> to vector<8x16xbf16>
    %c0_50 = arith.constant 0 : index
    %c3_51 = arith.constant 3 : index
    %c0_52 = arith.constant 0 : index
    %c0_53 = arith.constant 0 : index
    %73 = vector.load %arg7[%c0_50, %c3_51, %c0_52, %c0_53] : memref<1x4x8x16xbf16, #tpu.memory_space<vmem>>, vector<1x1x8x16xbf16>
    %74 = vector.shape_cast %73 : vector<1x1x8x16xbf16> to vector<8x16xbf16>
    %75 = vector.shape_cast %72 : vector<8x16xbf16> to vector<1x1x8x16xbf16>
    tpu.vector_store %arg7[%c0_50, %c3_51, %c0_52, %c0_53], %75 {strides = array<i32>} : memref<1x4x8x16xbf16, #tpu.memory_space<vmem>>, vector<1x1x8x16xbf16>,
    %76 = vector.extract_strided_slice %31 {offsets = [0, 176], sizes = [8, 16], strides = [1, 1]} : vector<8x192xbf16> to vector<8x16xbf16>
    %c0_54 = arith.constant 0 : index
    %c3_55 = arith.constant 3 : index
    %c0_56 = arith.constant 0 : index
    %c0_57 = arith.constant 0 : index
    %77 = vector.load %arg8[%c0_54, %c3_55, %c0_56, %c0_57] : memref<1x4x8x16xbf16, #tpu.memory_space<vmem>>, vector<1x1x8x16xbf16>
    %78 = vector.shape_cast %77 : vector<1x1x8x16xbf16> to vector<8x16xbf16>
    %79 = vector.shape_cast %76 : vector<8x16xbf16> to vector<1x1x8x16xbf16>
    tpu.vector_store %arg8[%c0_54, %c3_55, %c0_56, %c0_57], %79 {strides = array<i32>} : memref<1x4x8x16xbf16, #tpu.memory_space<vmem>>, vector<1x1x8x16xbf16>,
    return
  }
  func.func @transform_0(%arg0: i32, %arg1: i32) -> (i32, i32, i32) {
    %c0_i32 = arith.constant 0 : i32
    %c0_i32_0 = arith.constant 0 : i32
    return %arg0, %arg1, %c0_i32 : i32, i32, i32
  }
  func.func @transform_1(%arg0: i32, %arg1: i32) -> (i32, i32) {
    %c0_i32 = arith.constant 0 : i32
    %c0_i32_0 = arith.constant 0 : i32
    %c0_i32_1 = arith.constant 0 : i32
    return %c0_i32, %c0_i32_0 : i32, i32
  }
  func.func @transform_2(%arg0: i32, %arg1: i32) -> (i32, i32) {
    %c0_i32 = arith.constant 0 : i32
    %c0_i32_0 = arith.constant 0 : i32
    %c0_i32_1 = arith.constant 0 : i32
    return %c0_i32, %c0_i32_0 : i32, i32
  }
  func.func @transform_3(%arg0: i32, %arg1: i32) -> (i32, i32) {
    %c0_i32 = arith.constant 0 : i32
    %c0_i32_0 = arith.constant 0 : i32
    %c0_i32_1 = arith.constant 0 : i32
    return %c0_i32, %c0_i32_0 : i32, i32
  }
  func.func @transform_4(%arg0: i32, %arg1: i32) -> (i32, i32, i32, i32) {
    %c0_i32 = arith.constant 0 : i32
    %c0_i32_0 = arith.constant 0 : i32
    %c0_i32_1 = arith.constant 0 : i32
    return %arg0, %c0_i32, %arg1, %c0_i32_0 : i32, i32, i32, i32
  }
  func.func @transform_5(%arg0: i32, %arg1: i32) -> (i32, i32, i32, i32) {
    %c0_i32 = arith.constant 0 : i32
    %c0_i32_0 = arith.constant 0 : i32
    %c0_i32_1 = arith.constant 0 : i32
    return %arg0, %c0_i32, %arg1, %c0_i32_0 : i32, i32, i32, i32
  }
  func.func @transform_6(%arg0: i32, %arg1: i32) -> (i32, i32, i32, i32) {
    %c0_i32 = arith.constant 0 : i32
    %c0_i32_0 = arith.constant 0 : i32
    %c0_i32_1 = arith.constant 0 : i32
    return %arg0, %c0_i32, %arg1, %c0_i32_0 : i32, i32, i32, i32
  }
}

module attributes {stable_mosaic.version = 11 : i64} {
  func.func @_qkv_proj_kernel(%arg0: i32, %arg1: i32, %arg2: memref<1x8x32xf32, #tpu.memory_space<vmem>>, %arg3: memref<1x32xf32, #tpu.memory_space<vmem>>, %arg4: memref<1x32xf32, #tpu.memory_space<vmem>>, %arg5: memref<32x192xbf16, #tpu.memory_space<vmem>>, %arg6: memref<1x4x8x16xbf16, #tpu.memory_space<vmem>>, %arg7: memref<1x4x8x16xbf16, #tpu.memory_space<vmem>>, %arg8: memref<1x4x8x16xbf16, #tpu.memory_space<vmem>>) attributes {dimension_semantics = [#tpu.dimension_semantics<parallel>, #tpu.dimension_semantics<parallel>], iteration_bounds = array<i64: 2, 1>, scalar_prefetch = 0 : i64, scratch_operands = 0 : i64, tpu.core_type = #tpu.core_type<tc>, window_params = [{transform_indices = @transform_0, window_bounds = array<i64: 1, 8, 32>}, {pipeline_mode = #tpu.pipeline_mode<synchronous>, transform_indices = @transform_1, window_bounds = array<i64: 1, 32>}, {pipeline_mode = #tpu.pipeline_mode<synchronous>, transform_indices = @transform_2, window_bounds = array<i64: 1, 32>}, {pipeline_mode = #tpu.pipeline_mode<synchronous>, transform_indices = @transform_3, window_bounds = array<i64: 32, 192>}, {transform_indices = @transform_4, window_bounds = array<i64: 1, 4, 8, 16>}, {transform_indices = @transform_5, window_bounds = array<i64: 1, 4, 8, 16>}, {transform_indices = @transform_6, window_bounds = array<i64: 1, 4, 8, 16>}]} {
    %c0 = arith.constant 0 : index
    %c0_0 = arith.constant 0 : index
    %c0_1 = arith.constant 0 : index
    %0 = vector.load %arg2[%c0, %c0_0, %c0_1] : memref<1x8x32xf32, #tpu.memory_space<vmem>>, vector<1x8x32xf32>
    %1 = vector.shape_cast %0 : vector<1x8x32xf32> to vector<8x32xf32>
    %cst = arith.constant dense<0.000000e+00> : vector<8xf32>
    %2 = vector.multi_reduction <add>, %1, %cst [1] : vector<8x32xf32> to vector<8xf32>
    %3 = vector.shape_cast %2 : vector<8xf32> to vector<8x1xf32>
    %cst_2 = arith.constant 3.200000e+01 : f32
    %4 = vector.broadcast %cst_2 : f32 to vector<8x1xf32>
    %5 = arith.divf %3, %4 : vector<8x1xf32>
    %6 = vector.broadcast %5 : vector<8x1xf32> to vector<8x32xf32>
    %7 = arith.subf %1, %6 : vector<8x32xf32>
    %8 = arith.mulf %7, %7 : vector<8x32xf32>
    %cst_3 = arith.constant dense<0.000000e+00> : vector<8xf32>
    %9 = vector.multi_reduction <add>, %8, %cst_3 [1] : vector<8x32xf32> to vector<8xf32>
    %10 = vector.shape_cast %9 : vector<8xf32> to vector<8x1xf32>
    %cst_4 = arith.constant 3.200000e+01 : f32
    %11 = vector.broadcast %cst_4 : f32 to vector<8x1xf32>
    %12 = arith.divf %10, %11 : vector<8x1xf32>
    %cst_5 = arith.constant 9.99999974E-6 : f32
    %13 = vector.broadcast %cst_5 : f32 to vector<8x1xf32>
    %14 = arith.addf %12, %13 : vector<8x1xf32>
    %15 = math.rsqrt %14 : vector<8x1xf32>
    %16 = vector.broadcast %15 : vector<8x1xf32> to vector<8x32xf32>
    %17 = arith.mulf %7, %16 : vector<8x32xf32>
    %c0_6 = arith.constant 0 : index
    %c0_7 = arith.constant 0 : index
    %18 = vector.load %arg3[%c0_6, %c0_7] : memref<1x32xf32, #tpu.memory_space<vmem>>, vector<1x32xf32>
    %19 = vector.shape_cast %18 : vector<1x32xf32> to vector<32xf32>
    %20 = vector.shape_cast %19 : vector<32xf32> to vector<1x32xf32>
    %21 = vector.broadcast %20 : vector<1x32xf32> to vector<8x32xf32>
    %22 = arith.mulf %17, %21 : vector<8x32xf32>
    %c0_8 = arith.constant 0 : index
    %c0_9 = arith.constant 0 : index
    %23 = vector.load %arg4[%c0_8, %c0_9] : memref<1x32xf32, #tpu.memory_space<vmem>>, vector<1x32xf32>
    %24 = vector.shape_cast %23 : vector<1x32xf32> to vector<32xf32>
    %25 = vector.shape_cast %24 : vector<32xf32> to vector<1x32xf32>
    %26 = vector.broadcast %25 : vector<1x32xf32> to vector<8x32xf32>
    %27 = arith.addf %22, %26 : vector<8x32xf32>
    %28 = arith.truncf %27 : vector<8x32xf32> to vector<8x32xbf16>
    %c0_10 = arith.constant 0 : index
    %c0_11 = arith.constant 0 : index
    %29 = vector.load %arg5[%c0_10, %c0_11] : memref<32x192xbf16, #tpu.memory_space<vmem>>, vector<32x192xbf16>
    %cst_12 = arith.constant dense<0.000000e+00> : vector<8x192xf32>
    %30 = tpu.matmul %28, %29, %cst_12 {dimension_numbers = #tpu.dot_dimension_numbers<[1], [0], [0], [1], [0, 0, 1, 1], [], []>} : vector<8x32xbf16>, vector<32x192xbf16>, vector<8x192xf32> -> vector<8x192xf32>
    %31 = arith.truncf %30 : vector<8x192xf32> to vector<8x192xbf16>
    %32 = vector.extract_strided_slice %31 {offsets = [0, 0], sizes = [8, 16], strides = [1, 1]} : vector<8x192xbf16> to vector<8x16xbf16>
    %c0_13 = arith.constant 0 : index
    %c0_14 = arith.constant 0 : index
    %c0_15 = arith.constant 0 : index
    %c0_16 = arith.constant 0 : index
    %33 = vector.load %arg6[%c0_13, %c0_14, %c0_15, %c0_16] : memref<1x4x8x16xbf16, #tpu.memory_space<vmem>>, vector<1x1x8x16xbf16>
    %34 = vector.shape_cast %33 : vector<1x1x8x16xbf16> to vector<8x16xbf16>
    %35 = vector.shape_cast %32 : vector<8x16xbf16> to vector<1x1x8x16xbf16>
    tpu.vector_store %arg6[%c0_13, %c0_14, %c0_15, %c0_16], %35 {strides = array<i32>} : memref<1x4x8x16xbf16, #tpu.memory_space<vmem>>, vector<1x1x8x16xbf16>,
    %36 = vector.extract_strided_slice %31 {offsets = [0, 64], sizes = [8, 16], strides = [1, 1]} : vector<8x192xbf16> to vector<8x16xbf16>
    %c0_17 = arith.constant 0 : index
    %c0_18 = arith.constant 0 : index
    %c0_19 = arith.constant 0 : index
    %c0_20 = arith.constant 0 : index
    %37 = vector.load %arg7[%c0_17, %c0_18, %c0_19, %c0_20] : memref<1x4x8x16xbf16, #tpu.memory_space<vmem>>, vector<1x1x8x16xbf16>
    %38 = vector.shape_cast %37 : vector<1x1x8x16xbf16> to vector<8x16xbf16>
    %39 = vector.shape_cast %36 : vector<8x16xbf16> to vector<1x1x8x16xbf16>
    tpu.vector_store %arg7[%c0_17, %c0_18, %c0_19, %c0_20], %39 {strides = array<i32>} : memref<1x4x8x16xbf16, #tpu.memory_space<vmem>>, vector<1x1x8x16xbf16>,
    %40 = vector.extract_strided_slice %31 {offsets = [0, 128], sizes = [8, 16], strides = [1, 1]} : vector<8x192xbf16> to vector<8x16xbf16>
    %c0_21 = arith.constant 0 : index
    %c0_22 = arith.constant 0 : index
    %c0_23 = arith.constant 0 : index
    %c0_24 = arith.constant 0 : index
    %41 = vector.load %arg8[%c0_21, %c0_22, %c0_23, %c0_24] : memref<1x4x8x16xbf16, #tpu.memory_space<vmem>>, vector<1x1x8x16xbf16>
    %42 = vector.shape_cast %41 : vector<1x1x8x16xbf16> to vector<8x16xbf16>
    %43 = vector.shape_cast %40 : vector<8x16xbf16> to vector<1x1x8x16xbf16>
    tpu.vector_store %arg8[%c0_21, %c0_22, %c0_23, %c0_24], %43 {strides = array<i32>} : memref<1x4x8x16xbf16, #tpu.memory_space<vmem>>, vector<1x1x8x16xbf16>,
    %44 = vector.extract_strided_slice %31 {offsets = [0, 16], sizes = [8, 16], strides = [1, 1]} : vector<8x192xbf16> to vector<8x16xbf16>
    %c0_25 = arith.constant 0 : index
    %c1 = arith.constant 1 : index
    %c0_26 = arith.constant 0 : index
    %c0_27 = arith.constant 0 : index
    %45 = vector.load %arg6[%c0_25, %c1, %c0_26, %c0_27] : memref<1x4x8x16xbf16, #tpu.memory_space<vmem>>, vector<1x1x8x16xbf16>
    %46 = vector.shape_cast %45 : vector<1x1x8x16xbf16> to vector<8x16xbf16>
    %47 = vector.shape_cast %44 : vector<8x16xbf16> to vector<1x1x8x16xbf16>
    tpu.vector_store %arg6[%c0_25, %c1, %c0_26, %c0_27], %47 {strides = array<i32>} : memref<1x4x8x16xbf16, #tpu.memory_space<vmem>>, vector<1x1x8x16xbf16>,
    %48 = vector.extract_strided_slice %31 {offsets = [0, 80], sizes = [8, 16], strides = [1, 1]} : vector<8x192xbf16> to vector<8x16xbf16>
    %c0_28 = arith.constant 0 : index
    %c1_29 = arith.constant 1 : index
    %c0_30 = arith.constant 0 : index
    %c0_31 = arith.constant 0 : index
    %49 = vector.load %arg7[%c0_28, %c1_29, %c0_30, %c0_31] : memref<1x4x8x16xbf16, #tpu.memory_space<vmem>>, vector<1x1x8x16xbf16>
    %50 = vector.shape_cast %49 : vector<1x1x8x16xbf16> to vector<8x16xbf16>
    %51 = vector.shape_cast %48 : vector<8x16xbf16> to vector<1x1x8x16xbf16>
    tpu.vector_store %arg7[%c0_28, %c1_29, %c0_30, %c0_31], %51 {strides = array<i32>} : memref<1x4x8x16xbf16, #tpu.memory_space<vmem>>, vector<1x1x8x16xbf16>,
    %52 = vector.extract_strided_slice %31 {offsets = [0, 144], sizes = [8, 16], strides = [1, 1]} : vector<8x192xbf16> to vector<8x16xbf16>
    %c0_32 = arith.constant 0 : index
    %c1_33 = arith.constant 1 : index
    %c0_34 = arith.constant 0 : index
    %c0_35 = arith.constant 0 : index
    %53 = vector.load %arg8[%c0_32, %c1_33, %c0_34, %c0_35] : memref<1x4x8x16xbf16, #tpu.memory_space<vmem>>, vector<1x1x8x16xbf16>
    %54 = vector.shape_cast %53 : vector<1x1x8x16xbf16> to vector<8x16xbf16>
    %55 = vector.shape_cast %52 : vector<8x16xbf16> to vector<1x1x8x16xbf16>
    tpu.vector_store %arg8[%c0_32, %c1_33, %c0_34, %c0_35], %55 {strides = array<i32>} : memref<1x4x8x16xbf16, #tpu.memory_space<vmem>>, vector<1x1x8x16xbf16>,
    %56 = vector.extract_strided_slice %31 {offsets = [0, 32], sizes = [8, 16], strides = [1, 1]} : vector<8x192xbf16> to vector<8x16xbf16>
    %c0_36 = arith.constant 0 : index
    %c2 = arith.constant 2 : index
    %c0_37 = arith.constant 0 : index
    %c0_38 = arith.constant 0 : index
    %57 = vector.load %arg6[%c0_36, %c2, %c0_37, %c0_38] : memref<1x4x8x16xbf16, #tpu.memory_space<vmem>>, vector<1x1x8x16xbf16>
    %58 = vector.shape_cast %57 : vector<1x1x8x16xbf16> to vector<8x16xbf16>
    %59 = vector.shape_cast %56 : vector<8x16xbf16> to vector<1x1x8x16xbf16>
    tpu.vector_store %arg6[%c0_36, %c2, %c0_37, %c0_38], %59 {strides = array<i32>} : memref<1x4x8x16xbf16, #tpu.memory_space<vmem>>, vector<1x1x8x16xbf16>,
    %60 = vector.extract_strided_slice %31 {offsets = [0, 96], sizes = [8, 16], strides = [1, 1]} : vector<8x192xbf16> to vector<8x16xbf16>
    %c0_39 = arith.constant 0 : index
    %c2_40 = arith.constant 2 : index
    %c0_41 = arith.constant 0 : index
    %c0_42 = arith.constant 0 : index
    %61 = vector.load %arg7[%c0_39, %c2_40, %c0_41, %c0_42] : memref<1x4x8x16xbf16, #tpu.memory_space<vmem>>, vector<1x1x8x16xbf16>
    %62 = vector.shape_cast %61 : vector<1x1x8x16xbf16> to vector<8x16xbf16>
    %63 = vector.shape_cast %60 : vector<8x16xbf16> to vector<1x1x8x16xbf16>
    tpu.vector_store %arg7[%c0_39, %c2_40, %c0_41, %c0_42], %63 {strides = array<i32>} : memref<1x4x8x16xbf16, #tpu.memory_space<vmem>>, vector<1x1x8x16xbf16>,
    %64 = vector.extract_strided_slice %31 {offsets = [0, 160], sizes = [8, 16], strides = [1, 1]} : vector<8x192xbf16> to vector<8x16xbf16>
    %c0_43 = arith.constant 0 : index
    %c2_44 = arith.constant 2 : index
    %c0_45 = arith.constant 0 : index
    %c0_46 = arith.constant 0 : index
    %65 = vector.load %arg8[%c0_43, %c2_44, %c0_45, %c0_46] : memref<1x4x8x16xbf16, #tpu.memory_space<vmem>>, vector<1x1x8x16xbf16>
    %66 = vector.shape_cast %65 : vector<1x1x8x16xbf16> to vector<8x16xbf16>
    %67 = vector.shape_cast %64 : vector<8x16xbf16> to vector<1x1x8x16xbf16>
    tpu.vector_store %arg8[%c0_43, %c2_44, %c0_45, %c0_46], %67 {strides = array<i32>} : memref<1x4x8x16xbf16, #tpu.memory_space<vmem>>, vector<1x1x8x16xbf16>,
    %68 = vector.extract_strided_slice %31 {offsets = [0, 48], sizes = [8, 16], strides = [1, 1]} : vector<8x192xbf16> to vector<8x16xbf16>
    %c0_47 = arith.constant 0 : index
    %c3 = arith.constant 3 : index
    %c0_48 = arith.constant 0 : index
    %c0_49 = arith.constant 0 : index
    %69 = vector.load %arg6[%c0_47, %c3, %c0_48, %c0_49] : memref<1x4x8x16xbf16, #tpu.memory_space<vmem>>, vector<1x1x8x16xbf16>
    %70 = vector.shape_cast %69 : vector<1x1x8x16xbf16> to vector<8x16xbf16>
    %71 = vector.shape_cast %68 : vector<8x16xbf16> to vector<1x1x8x16xbf16>
    tpu.vector_store %arg6[%c0_47, %c3, %c0_48, %c0_49], %71 {strides = array<i32>} : memref<1x4x8x16xbf16, #tpu.memory_space<vmem>>, vector<1x1x8x16xbf16>,
    %72 = vector.extract_strided_slice %31 {offsets = [0, 112], sizes = [8, 16], strides = [1, 1]} : vector<8x192xbf16> to vector<8x16xbf16>
    %c0_50 = arith.constant 0 : index
    %c3_51 = arith.constant 3 : index
    %c0_52 = arith.constant 0 : index
    %c0_53 = arith.constant 0 : index
    %73 = vector.load %arg7[%c0_50, %c3_51, %c0_52, %c0_53] : memref<1x4x8x16xbf16, #tpu.memory_space<vmem>>, vector<1x1x8x16xbf16>
    %74 = vector.shape_cast %73 : vector<1x1x8x16xbf16> to vector<8x16xbf16>
    %75 = vector.shape_cast %72 : vector<8x16xbf16> to vector<1x1x8x16xbf16>
    tpu.vector_store %arg7[%c0_50, %c3_51, %c0_52, %c0_53], %75 {strides = array<i32>} : memref<1x4x8x16xbf16, #tpu.memory_space<vmem>>, vector<1x1x8x16xbf16>,
    %76 = vector.extract_strided_slice %31 {offsets = [0, 176], sizes = [8, 16], strides = [1, 1]} : vector<8x192xbf16> to vector<8x16xbf16>
    %c0_54 = arith.constant 0 : index
    %c3_55 = arith.constant 3 : index
    %c0_56 = arith.constant 0 : index
    %c0_57 = arith.constant 0 : index
    %77 = vector.load %arg8[%c0_54, %c3_55, %c0_56, %c0_57] : memref<1x4x8x16xbf16, #tpu.memory_space<vmem>>, vector<1x1x8x16xbf16>
    %78 = vector.shape_cast %77 : vector<1x1x8x16xbf16> to vector<8x16xbf16>
    %79 = vector.shape_cast %76 : vector<8x16xbf16> to vector<1x1x8x16xbf16>
    tpu.vector_store %arg8[%c0_54, %c3_55, %c0_56, %c0_57], %79 {strides = array<i32>} : memref<1x4x8x16xbf16, #tpu.memory_space<vmem>>, vector<1x1x8x16xbf16>,
    return
  }
  func.func @transform_0(%arg0: i32, %arg1: i32) -> (i32, i32, i32) {
    %c0_i32 = arith.constant 0 : i32
    %c0_i32_0 = arith.constant 0 : i32
    return %arg0, %arg1, %c0_i32 : i32, i32, i32
  }
  func.func @transform_1(%arg0: i32, %arg1: i32) -> (i32, i32) {
    %c0_i32 = arith.constant 0 : i32
    %c0_i32_0 = arith.constant 0 : i32
    %c0_i32_1 = arith.constant 0 : i32
    return %c0_i32, %c0_i32_0 : i32, i32
  }
  func.func @transform_2(%arg0: i32, %arg1: i32) -> (i32, i32) {
    %c0_i32 = arith.constant 0 : i32
    %c0_i32_0 = arith.constant 0 : i32
    %c0_i32_1 = arith.constant 0 : i32
    return %c0_i32, %c0_i32_0 : i32, i32
  }
  func.func @transform_3(%arg0: i32, %arg1: i32) -> (i32, i32) {
    %c0_i32 = arith.constant 0 : i32
    %c0_i32_0 = arith.constant 0 : i32
    %c0_i32_1 = arith.constant 0 : i32
    return %c0_i32, %c0_i32_0 : i32, i32
  }
  func.func @transform_4(%arg0: i32, %arg1: i32) -> (i32, i32, i32, i32) {
    %c0_i32 = arith.constant 0 : i32
    %c0_i32_0 = arith.constant 0 : i32
    %c0_i32_1 = arith.constant 0 : i32
    return %arg0, %c0_i32, %arg1, %c0_i32_0 : i32, i32, i32, i32
  }
  func.func @transform_5(%arg0: i32, %arg1: i32) -> (i32, i32, i32, i32) {
    %c0_i32 = arith.constant 0 : i32
    %c0_i32_0 = arith.constant 0 : i32
    %c0_i32_1 = arith.constant 0 : i32
    return %arg0, %c0_i32, %arg1, %c0_i32_0 : i32, i32, i32, i32
  }
  func.func @transform_6(%arg0: i32, %arg1: i32) -> (i32, i32, i32, i32) {
    %c0_i32 = arith.constant 0 : i32
    %c0_i32_0 = arith.constant 0 : i32
    %c0_i32_1 = arith.constant 0 : i32
    return %arg0, %c0_i32, %arg1, %c0_i32_0 : i32, i32, i32, i32
  }
}

module attributes {stable_mosaic.version = 11 : i64} {
  func.func @_ffn_kernel(%arg0: i32, %arg1: memref<8x32xf32, #tpu.memory_space<vmem>>, %arg2: memref<1x32xf32, #tpu.memory_space<vmem>>, %arg3: memref<1x32xf32, #tpu.memory_space<vmem>>, %arg4: memref<32x64xbf16, #tpu.memory_space<vmem>>, %arg5: memref<1x64xf32, #tpu.memory_space<vmem>>, %arg6: memref<64x32xbf16, #tpu.memory_space<vmem>>, %arg7: memref<1x32xf32, #tpu.memory_space<vmem>>, %arg8: memref<1x32xf32, #tpu.memory_space<vmem>>, %arg9: memref<1x32xf32, #tpu.memory_space<vmem>>, %arg10: memref<8x32xf32, #tpu.memory_space<vmem>>) attributes {dimension_semantics = [#tpu.dimension_semantics<parallel>], iteration_bounds = array<i64: 2>, scalar_prefetch = 0 : i64, scratch_operands = 0 : i64, tpu.core_type = #tpu.core_type<tc>, window_params = [{transform_indices = @transform_0, window_bounds = array<i64: 8, 32>}, {pipeline_mode = #tpu.pipeline_mode<synchronous>, transform_indices = @transform_1, window_bounds = array<i64: 1, 32>}, {pipeline_mode = #tpu.pipeline_mode<synchronous>, transform_indices = @transform_2, window_bounds = array<i64: 1, 32>}, {pipeline_mode = #tpu.pipeline_mode<synchronous>, transform_indices = @transform_3, window_bounds = array<i64: 32, 64>}, {pipeline_mode = #tpu.pipeline_mode<synchronous>, transform_indices = @transform_4, window_bounds = array<i64: 1, 64>}, {pipeline_mode = #tpu.pipeline_mode<synchronous>, transform_indices = @transform_5, window_bounds = array<i64: 64, 32>}, {pipeline_mode = #tpu.pipeline_mode<synchronous>, transform_indices = @transform_6, window_bounds = array<i64: 1, 32>}, {pipeline_mode = #tpu.pipeline_mode<synchronous>, transform_indices = @transform_7, window_bounds = array<i64: 1, 32>}, {pipeline_mode = #tpu.pipeline_mode<synchronous>, transform_indices = @transform_8, window_bounds = array<i64: 1, 32>}, {transform_indices = @transform_9, window_bounds = array<i64: 8, 32>}]} {
    %c0 = arith.constant 0 : index
    %c0_0 = arith.constant 0 : index
    %0 = vector.load %arg1[%c0, %c0_0] : memref<8x32xf32, #tpu.memory_space<vmem>>, vector<8x32xf32>
    %cst = arith.constant dense<0.000000e+00> : vector<8xf32>
    %1 = vector.multi_reduction <add>, %0, %cst [1] : vector<8x32xf32> to vector<8xf32>
    %2 = vector.shape_cast %1 : vector<8xf32> to vector<8x1xf32>
    %cst_1 = arith.constant 3.200000e+01 : f32
    %3 = vector.broadcast %cst_1 : f32 to vector<8x1xf32>
    %4 = arith.divf %2, %3 : vector<8x1xf32>
    %5 = vector.broadcast %4 : vector<8x1xf32> to vector<8x32xf32>
    %6 = arith.subf %0, %5 : vector<8x32xf32>
    %7 = arith.mulf %6, %6 : vector<8x32xf32>
    %cst_2 = arith.constant dense<0.000000e+00> : vector<8xf32>
    %8 = vector.multi_reduction <add>, %7, %cst_2 [1] : vector<8x32xf32> to vector<8xf32>
    %9 = vector.shape_cast %8 : vector<8xf32> to vector<8x1xf32>
    %cst_3 = arith.constant 3.200000e+01 : f32
    %10 = vector.broadcast %cst_3 : f32 to vector<8x1xf32>
    %11 = arith.divf %9, %10 : vector<8x1xf32>
    %cst_4 = arith.constant 9.99999974E-6 : f32
    %12 = vector.broadcast %cst_4 : f32 to vector<8x1xf32>
    %13 = arith.addf %11, %12 : vector<8x1xf32>
    %14 = math.rsqrt %13 : vector<8x1xf32>
    %15 = vector.broadcast %14 : vector<8x1xf32> to vector<8x32xf32>
    %16 = arith.mulf %6, %15 : vector<8x32xf32>
    %c0_5 = arith.constant 0 : index
    %c0_6 = arith.constant 0 : index
    %17 = vector.load %arg2[%c0_5, %c0_6] : memref<1x32xf32, #tpu.memory_space<vmem>>, vector<1x32xf32>
    %18 = vector.shape_cast %17 : vector<1x32xf32> to vector<32xf32>
    %19 = vector.shape_cast %18 : vector<32xf32> to vector<1x32xf32>
    %20 = vector.broadcast %19 : vector<1x32xf32> to vector<8x32xf32>
    %21 = arith.mulf %16, %20 : vector<8x32xf32>
    %c0_7 = arith.constant 0 : index
    %c0_8 = arith.constant 0 : index
    %22 = vector.load %arg3[%c0_7, %c0_8] : memref<1x32xf32, #tpu.memory_space<vmem>>, vector<1x32xf32>
    %23 = vector.shape_cast %22 : vector<1x32xf32> to vector<32xf32>
    %24 = vector.shape_cast %23 : vector<32xf32> to vector<1x32xf32>
    %25 = vector.broadcast %24 : vector<1x32xf32> to vector<8x32xf32>
    %26 = arith.addf %21, %25 : vector<8x32xf32>
    %27 = arith.truncf %26 : vector<8x32xf32> to vector<8x32xbf16>
    %c0_9 = arith.constant 0 : index
    %c0_10 = arith.constant 0 : index
    %28 = vector.load %arg4[%c0_9, %c0_10] : memref<32x64xbf16, #tpu.memory_space<vmem>>, vector<32x64xbf16>
    %cst_11 = arith.constant dense<0.000000e+00> : vector<8x64xf32>
    %29 = tpu.matmul %27, %28, %cst_11 {dimension_numbers = #tpu.dot_dimension_numbers<[1], [0], [0], [1], [0, 0, 1, 1], [], []>} : vector<8x32xbf16>, vector<32x64xbf16>, vector<8x64xf32> -> vector<8x64xf32>
    %c0_12 = arith.constant 0 : index
    %c0_13 = arith.constant 0 : index
    %30 = vector.load %arg5[%c0_12, %c0_13] : memref<1x64xf32, #tpu.memory_space<vmem>>, vector<1x64xf32>
    %31 = vector.shape_cast %30 : vector<1x64xf32> to vector<64xf32>
    %32 = vector.shape_cast %31 : vector<64xf32> to vector<1x64xf32>
    %33 = vector.broadcast %32 : vector<1x64xf32> to vector<8x64xf32>
    %34 = arith.addf %29, %33 : vector<8x64xf32>
    %cst_14 = arith.constant 5.000000e-01 : f32
    %35 = vector.broadcast %cst_14 : f32 to vector<8x64xf32>
    %36 = arith.mulf %35, %34 : vector<8x64xf32>
    %cst_15 = arith.constant 4.471500e-02 : f32
    %37 = vector.broadcast %cst_15 : f32 to vector<8x64xf32>
    %38 = arith.mulf %37, %34 : vector<8x64xf32>
    %39 = arith.mulf %38, %34 : vector<8x64xf32>
    %40 = arith.mulf %39, %34 : vector<8x64xf32>
    %41 = arith.addf %34, %40 : vector<8x64xf32>
    %cst_16 = arith.constant 0.797884583 : f32
    %42 = vector.broadcast %cst_16 : f32 to vector<8x64xf32>
    %43 = arith.mulf %42, %41 : vector<8x64xf32>
    %44 = math.tanh %43 : vector<8x64xf32>
    %cst_17 = arith.constant 1.000000e+00 : f32
    %45 = vector.broadcast %cst_17 : f32 to vector<8x64xf32>
    %46 = arith.addf %45, %44 : vector<8x64xf32>
    %47 = arith.mulf %36, %46 : vector<8x64xf32>
    %48 = arith.truncf %47 : vector<8x64xf32> to vector<8x64xbf16>
    %c0_18 = arith.constant 0 : index
    %c0_19 = arith.constant 0 : index
    %49 = vector.load %arg6[%c0_18, %c0_19] : memref<64x32xbf16, #tpu.memory_space<vmem>>, vector<64x32xbf16>
    %cst_20 = arith.constant dense<0.000000e+00> : vector<8x32xf32>
    %50 = tpu.matmul %48, %49, %cst_20 {dimension_numbers = #tpu.dot_dimension_numbers<[1], [0], [0], [1], [0, 0, 1, 1], [], []>} : vector<8x64xbf16>, vector<64x32xbf16>, vector<8x32xf32> -> vector<8x32xf32>
    %c0_21 = arith.constant 0 : index
    %c0_22 = arith.constant 0 : index
    %51 = vector.load %arg7[%c0_21, %c0_22] : memref<1x32xf32, #tpu.memory_space<vmem>>, vector<1x32xf32>
    %52 = vector.shape_cast %51 : vector<1x32xf32> to vector<32xf32>
    %53 = vector.shape_cast %52 : vector<32xf32> to vector<1x32xf32>
    %54 = vector.broadcast %53 : vector<1x32xf32> to vector<8x32xf32>
    %55 = arith.addf %50, %54 : vector<8x32xf32>
    %56 = arith.addf %55, %0 : vector<8x32xf32>
    %cst_23 = arith.constant dense<0.000000e+00> : vector<8xf32>
    %57 = vector.multi_reduction <add>, %56, %cst_23 [1] : vector<8x32xf32> to vector<8xf32>
    %58 = vector.shape_cast %57 : vector<8xf32> to vector<8x1xf32>
    %cst_24 = arith.constant 3.200000e+01 : f32
    %59 = vector.broadcast %cst_24 : f32 to vector<8x1xf32>
    %60 = arith.divf %58, %59 : vector<8x1xf32>
    %61 = vector.broadcast %60 : vector<8x1xf32> to vector<8x32xf32>
    %62 = arith.subf %56, %61 : vector<8x32xf32>
    %63 = arith.mulf %62, %62 : vector<8x32xf32>
    %cst_25 = arith.constant dense<0.000000e+00> : vector<8xf32>
    %64 = vector.multi_reduction <add>, %63, %cst_25 [1] : vector<8x32xf32> to vector<8xf32>
    %65 = vector.shape_cast %64 : vector<8xf32> to vector<8x1xf32>
    %cst_26 = arith.constant 3.200000e+01 : f32
    %66 = vector.broadcast %cst_26 : f32 to vector<8x1xf32>
    %67 = arith.divf %65, %66 : vector<8x1xf32>
    %cst_27 = arith.constant 9.99999974E-6 : f32
    %68 = vector.broadcast %cst_27 : f32 to vector<8x1xf32>
    %69 = arith.addf %67, %68 : vector<8x1xf32>
    %70 = math.rsqrt %69 : vector<8x1xf32>
    %71 = vector.broadcast %70 : vector<8x1xf32> to vector<8x32xf32>
    %72 = arith.mulf %62, %71 : vector<8x32xf32>
    %c0_28 = arith.constant 0 : index
    %c0_29 = arith.constant 0 : index
    %73 = vector.load %arg8[%c0_28, %c0_29] : memref<1x32xf32, #tpu.memory_space<vmem>>, vector<1x32xf32>
    %74 = vector.shape_cast %73 : vector<1x32xf32> to vector<32xf32>
    %75 = vector.shape_cast %74 : vector<32xf32> to vector<1x32xf32>
    %76 = vector.broadcast %75 : vector<1x32xf32> to vector<8x32xf32>
    %77 = arith.mulf %72, %76 : vector<8x32xf32>
    %c0_30 = arith.constant 0 : index
    %c0_31 = arith.constant 0 : index
    %78 = vector.load %arg9[%c0_30, %c0_31] : memref<1x32xf32, #tpu.memory_space<vmem>>, vector<1x32xf32>
    %79 = vector.shape_cast %78 : vector<1x32xf32> to vector<32xf32>
    %80 = vector.shape_cast %79 : vector<32xf32> to vector<1x32xf32>
    %81 = vector.broadcast %80 : vector<1x32xf32> to vector<8x32xf32>
    %82 = arith.addf %77, %81 : vector<8x32xf32>
    %c0_32 = arith.constant 0 : index
    %c0_33 = arith.constant 0 : index
    %83 = vector.load %arg10[%c0_32, %c0_33] : memref<8x32xf32, #tpu.memory_space<vmem>>, vector<8x32xf32>
    tpu.vector_store %arg10[%c0_32, %c0_33], %82 {strides = array<i32>} : memref<8x32xf32, #tpu.memory_space<vmem>>, vector<8x32xf32>,
    return
  }
  func.func @transform_0(%arg0: i32) -> (i32, i32) {
    %c0_i32 = arith.constant 0 : i32
    %c0_i32_0 = arith.constant 0 : i32
    return %arg0, %c0_i32 : i32, i32
  }
  func.func @transform_1(%arg0: i32) -> (i32, i32) {
    %c0_i32 = arith.constant 0 : i32
    %c0_i32_0 = arith.constant 0 : i32
    %c0_i32_1 = arith.constant 0 : i32
    return %c0_i32, %c0_i32_0 : i32, i32
  }
  func.func @transform_2(%arg0: i32) -> (i32, i32) {
    %c0_i32 = arith.constant 0 : i32
    %c0_i32_0 = arith.constant 0 : i32
    %c0_i32_1 = arith.constant 0 : i32
    return %c0_i32, %c0_i32_0 : i32, i32
  }
  func.func @transform_3(%arg0: i32) -> (i32, i32) {
    %c0_i32 = arith.constant 0 : i32
    %c0_i32_0 = arith.constant 0 : i32
    %c0_i32_1 = arith.constant 0 : i32
    return %c0_i32, %c0_i32_0 : i32, i32
  }
  func.func @transform_4(%arg0: i32) -> (i32, i32) {
    %c0_i32 = arith.constant 0 : i32
    %c0_i32_0 = arith.constant 0 : i32
    %c0_i32_1 = arith.constant 0 : i32
    return %c0_i32, %c0_i32_0 : i32, i32
  }
  func.func @transform_5(%arg0: i32) -> (i32, i32) {
    %c0_i32 = arith.constant 0 : i32
    %c0_i32_0 = arith.constant 0 : i32
    %c0_i32_1 = arith.constant 0 : i32
    return %c0_i32, %c0_i32_0 : i32, i32
  }
  func.func @transform_6(%arg0: i32) -> (i32, i32) {
    %c0_i32 = arith.constant 0 : i32
    %c0_i32_0 = arith.constant 0 : i32
    %c0_i32_1 = arith.constant 0 : i32
    return %c0_i32, %c0_i32_0 : i32, i32
  }
  func.func @transform_7(%arg0: i32) -> (i32, i32) {
    %c0_i32 = arith.constant 0 : i32
    %c0_i32_0 = arith.constant 0 : i32
    %c0_i32_1 = arith.constant 0 : i32
    return %c0_i32, %c0_i32_0 : i32, i32
  }
  func.func @transform_8(%arg0: i32) -> (i32, i32) {
    %c0_i32 = arith.constant 0 : i32
    %c0_i32_0 = arith.constant 0 : i32
    %c0_i32_1 = arith.constant 0 : i32
    return %c0_i32, %c0_i32_0 : i32, i32
  }
  func.func @transform_9(%arg0: i32) -> (i32, i32) {
    %c0_i32 = arith.constant 0 : i32
    %c0_i32_0 = arith.constant 0 : i32
    return %arg0, %c0_i32 : i32, i32
  }
}

</mosaic_0001>

<bundles_post_ra>
// kernel: tpu_custom_call.1
= control target key start
LH: loop header
LB: loop body
LE: loop exit
PB: predicated region body
PF: predicated region fallthrough
CT: control target
= control target key end

     0   :  { %6 = vsyncpa [#allocation3], 0  ;;  %s286_s0 = inlined_call_operand.hbm [shape: f32[8,128], index: 0, kind: input, shape index: {}]   ;;  %s287_s1 = inlined_call_operand.hbm [shape: f32[8,128], index: 1, kind: output, shape index: {}]  }
   0x1   :  { %7 = vsyncpa [#allocation4], 0  ;;  %s269_s6 = smov 0  }
   0x2 LB: > { %s148_s7 = sadd.s32 4294967295, %s255_s6   ;;  %p149_p0 = scmp.ge.s32.totalorder %s255_s6, 1  ;;  %s255_s6 = sphi %s269_s6, %s13_s6  }
   0x3   : > { %p60_p1 = scmp.lt.s32.totalorder %s255_s6, 3  ;;  %s72_s10 = sshll.u32 %s286_s0, 4  ;;  %s73_s10 = int_to_ptr.hbm [resolvable:$true] %s72_s10 }
   0x4   : > { %p169_p3 = scmp.eq.s32.totalorder %s148_s7, 0  ;;  %s257_s11 = smov [#allocation2]  }
   0x5   : > { %p61_p2 = pnand %p149_p0, %p60_p1  ;;  %s74_s12 = sshll.u32 %s257_s11, 4  ;;  %s75_s12 = int_to_ptr.vmem [resolvable:$true] %s74_s12 }
   0x7   : > { %p165_p4 = pneg %p61_p2  ;;  %87 = sbr.rel (%p61_p2) target bundleno = 19 (0x13), region = 24 }
   0x9   : > { %p166_p5 = pnand %p169_p3, %p165_p4 }
   0xb   : > { %168 = dma.hbm_to_vmem [thread:$0]  (!%p166_p5), %s73_s10, 128, %s75_s12, [#allocation3]  }
   0xc   : > { %246 = dma.done.wait (%p169_p3), [#allocation3], 128  }
   0xd   : > { %248 = vsyncadd (%p169_p3), [#allocation3], 4294967168  ;;  %s258_s13 = smov [#allocation5]   ;;  %s108_s17 = sshll.u32 %s287_s1, 4  ;;  %v98_v0 = vld [vmem:[#allocation2] sm:$0xff]  ;;  %s109_s17 = int_to_ptr.hbm [resolvable:$true] %s108_s17 }
   0xe   : > { %s106_s14 = sshll.u32 %s258_s13, 4  ;;  %p171_p6 = scmp.eq.s32.totalorder %s148_s7, 1  ;;  %99 = vst [vmem:[#allocation5] sm:$0xff] %v98_v0  ;;  %s107_s14 = int_to_ptr.vmem [resolvable:$true] %s106_s14 }
  0x10   : > { %162 = dma.vmem_to_hbm [thread:$0]  (%p171_p6), %s107_s14, 128, %s109_s17, [#allocation4]  }
  0x11   : > { %250 = dma.done.wait (%p171_p6), [#allocation4], 128  }
  0x12   : > { %252 = vsyncadd (%p171_p6), [#allocation4], 4294967168 }
  0x13 PF: > { %s13_s6 = sadd.s32 1, %s255_s6  }
  0x14   : > { %p10_p7 = scmp.ge.s32.totalorder %s13_s6, 4  }
  0x16   :  { %12 = sbr.rel (!%p10_p7) target bundleno = 2 (0x2), region = 53 }
  0x1b   :  { %122 = vsyncpa [#allocation3], 1 }
  0x1c   :  { %124 = vsyncpa [#allocation3 + $0x1], 1 }
  0x1d   :  { %125 = vsyncpa [#allocation4], 1 }
  0x1e   :  { %127 = vsyncpa [#allocation4 + $0x1], 1 }

// kernel: transformer_forward.8
= control target key start
LH: loop header
LB: loop body
LE: loop exit
PB: predicated region body
PF: predicated region fallthrough
CT: control target
= control target key end

     0   :  { %s644_s30 = smov 0   ;;  %s707_s0 = inlined_call_operand.vmem [shape: f32[16,32], index: 0, kind: input, shape index: {}]   ;;  %s708_s1 = inlined_call_operand.vmem [shape: f32[1,32], index: 1, kind: input, shape index: {}]   ;;  %s709_s2 = inlined_call_operand.vmem [shape: f32[1,32], index: 2, kind: input, shape index: {}]   ;;  %s710_s3 = inlined_call_operand.vmem [shape: bf16[32,64], index: 3, kind: input, shape index: {}]   ;;  %s711_s4 = inlined_call_operand.vmem [shape: f32[1,64], index: 4, kind: input, shape index: {}]   ;;  %s712_s5 = inlined_call_operand.vmem [shape: bf16[64,32], index: 5, kind: input, shape index: {}]   ;;  %s713_s6 = inlined_call_operand.vmem [shape: f32[1,32], index: 6, kind: input, shape index: {}]   ;;  %s714_s7 = inlined_call_operand.vmem [shape: f32[1,32], index: 7, kind: input, shape index: {}]   ;;  %s715_s8 = inlined_call_operand.vmem [shape: f32[1,32], index: 8, kind: input, shape index: {}]   ;;  %s716_s9 = inlined_call_operand.vmem [shape: f32[16,32], index: 9, kind: output, shape index: {}]  }
   0x1 LB: > { %s525_s10 = sadd.s32 4294967295, %s591_s30   ;;  %p529_p0 = scmp.ge.s32.totalorder %s591_s30, 1  ;;  %s591_s30 = sphi %s644_s30, %s19_s30  }
   0x2   : > { %p286_p1 = scmp.lt.s32.totalorder %s591_s30, 3 }
   0x4   : > { %p287_p2 = pnand %p529_p0, %p286_p1 }
   0x5   : > { %p320_p3 = scmp.lt.s32.totalorder (!%p287_p2), %s525_s10, 1 }
   0x6   : > { %290 = sbr.rel (%p287_p2) target bundleno = 570 (0x23a), region = 56 }
   0xb   : > { %s718_s10 = smov (!%p320_p3, %s525_s10), 1  ;;  %vm330_vm0 = vcmask 261120   ;;  %v593_v2 = vmov 32.0   ;;  %v561_v14 = vld [vmem:[%s710_s3 + $0x8] sm:$0xff]  ;;  %v560_v15 = vld [vmem:[%s710_s3] sm:$0xff]  ;;  %v565_v32 = vld [vmem:[%s712_s5 + $0x18] sm:$0xff] }
   0xc   : > { %s530_s7 = sshll.u32 %s718_s10, 3  ;;  %579 = vrcp.f32 %v593_v2  ;;  %400 = vmatpush.bf16.msra.mxu0 %v561_v14  ;;  %v575_v25 = vld [vmem:[%s708_s1] ss:$0 sm:$0xff]  ;;  %461 = vmatpush.bf16.msra.mxu1 %v565_v32  ;;  %v564_v33 = vld [vmem:[%s712_s5 + $0x10] sm:$0xff]  ;;  %v563_v34 = vld [vmem:[%s712_s5 + $0x8] sm:$0xff]  ;;  %vm453_vm5 = vcmask 523264  }
   0xd   : > { %s323_s12 = scalar_lea.vmem %s707_s0, %s530_s7  ;;  %v576_v28 = vld [vmem:[%s709_s2] ss:$0 sm:$0xff]  ;;  %s327_s15 = scalar_lea.vmem %s716_s9, %s530_s7 }
   0xe   : > { %v660_v0 = vld [vmem:[%s323_s12] sm:$0xff] }
   0xf   : > { %v331_v1 = vsel %vm330_vm0, %v660_v0, 0.0  ;;  %v562_v35 = vld [vmem:[%s712_s5] sm:$0xff] }
  0x10   : > { %332 = vadd.xlane.f32.xlu0 %v331_v1  ;;  %401 = vmatpush.bf16.msra.mxu0 %v560_v15  ;;  %v577_v36 = vld [vmem:[%s711_s4] ss:$0 sm:$0xff] }
  0x11   : > { %462 = vmatpush.bf16.msra.mxu1 %v564_v33  ;;  %v578_v50 = vld [vmem:[%s713_s6] ss:$0 sm:$0xff] }
  0x12   : > { %v580_v3 = vpop.eup %579 }
  0x13   : > { %v335_v4 = vmul.f32 32.0, %v580_v3  ;;  %vm339_vm1 = vweird.f32 %v580_v3 }
  0x15   : > { %v336_v5 = vsub.f32 1.0, %v335_v4  ;;  %463 = vmatpush.bf16.msra.mxu1 %v563_v34 }
  0x17   : > { %v337_v6 = vmul.f32 %v580_v3, %v336_v5 }
  0x19   : > { %v338_v7 = vadd.f32 %v580_v3, %v337_v6  ;;  %464 = vmatpush.bf16.msra.mxu1 %v562_v35 }
  0x1b   : > { %v340_v8 = vsel %vm339_vm1, %v580_v3, %v338_v7 }
  0x83   : > { %v333_v9 = vpop.xlane.xlu0 %332 }
  0x84   : > { %v341_v10 = vmul.f32 %v340_v8, %v333_v9 }
  0x86   : > { %v342_v11 = vsub.f32 %v660_v0, %v341_v10 }
  0x88   : > { %v343_v12 = vmul.f32 %v342_v11, %v342_v11 }
  0x8a   : > { %v344_v13 = vsel %vm330_vm0, %v343_v12, 0.0 }
  0x8b   : > { %345 = vadd.xlane.f32.xlu0 %v344_v13 }
  0xfe   : > { %v346_v16 = vpop.xlane.xlu0 %345 }
  0xff   : > { %v347_v17 = vmul.f32 %v346_v16, %v340_v8 }
 0x101   : > { %v348_v18 = vadd.f32 1e-05, %v347_v17 }
 0x103   : > { %581 = vrsqrt.f32 %v348_v18  ;;  %vm355_vm3 = vweird.f32 %v348_v18 }
 0x109   : > { %v582_v19 = vpop.eup %581 }
 0x10a   : > { %v350_v20 = vmul.f32 %v582_v19, %v348_v18  ;;  %vm356_vm2 = vweird.f32 %v582_v19 }
 0x10b   : > { %vm357_vm4 = vmor %vm355_vm3, %vm356_vm2 }
 0x10c   : > { %v351_v21 = vmul.f32 %v582_v19, %v350_v20 }
 0x10e   : > { %v352_v22 = vmul.f32 0.5, %v351_v21 }
 0x110   : > { %v353_v23 = vsub.f32 1.5, %v352_v22 }
 0x112   : > { %v354_v24 = vmul.f32 %v582_v19, %v353_v23 }
 0x114   : > { %v358_v26 = vsel %vm357_vm4, %v582_v19, %v354_v24 }
 0x115   : > { %v359_v27 = vmul.f32 %v358_v26, %v342_v11 }
 0x117   : > { %v364_v29 = vmul.f32 %v575_v25, %v359_v27 }
 0x119   : > { %v369_v30 = vadd.f32 %v576_v28, %v364_v29 }
 0x11b   : > { %v370_v31 = vpack.c.bf16 %v369_v30, %v369_v30 }
 0x11d   : > { %540 = vmatmul.msk.bf16.vlgmr.msra.gmra.mxu0 %vm330_vm0, %v370_v31 }
 0x19a   : > { %v403_v37 = vpop.f32.mrf.mxu0 }
 0x19b   : > { %v404_v38 = vadd.f32 %v577_v36, %v403_v37 }
 0x19d   : > { %v408_v39 = vmul.f32 0.044715, %v404_v38  ;;  %v407_v46 = vmul.f32 0.5, %v404_v38 }
 0x19f   : > { %v409_v40 = vmul.f32 %v408_v39, %v404_v38 }
 0x1a1   : > { %v410_v41 = vmul.f32 %v409_v40, %v404_v38 }
 0x1a2   : > { %v405_v42 = vpop.f32.mrf.mxu0 }
 0x1a3   : > { %v411_v43 = vadd.f32 %v410_v41, %v404_v38 }
 0x1a5   : > { %v412_v44 = vmul.f32 0.7978846, %v411_v43 }
 0x1a7   : > { %583 = vtanh.f32 %v412_v44 }
 0x1ad   : > { %v584_v45 = vpop.eup %583 }
 0x1ae   : > { %v414_v47 = vadd.f32 1.0, %v584_v45 }
 0x1b0   : > { %v415_v48 = vmul.f32 %v414_v47, %v407_v46 }
 0x1b2   : > { %v416_v49 = vpack.c.bf16 %v415_v48, %v415_v48 }
 0x1b4   : > { %557 = vmatmul.msk.bf16.vlgmr.msra.gmra.mxu1 %vm453_vm5, %v416_v49 }
 0x231   : > { %v466_v51 = vpop.f32.mrf.mxu1 }
 0x232   : > { %v467_v52 = vadd.f32 %v578_v50, %v466_v51 }
 0x234   : > { %v470_v53 = vadd.f32 %v467_v52, %v660_v0 }
 0x236   : > { %471 = vst.msk [vmem:[%s327_s15] sm:$0xff] %vm330_vm0, %v470_v53 }
 0x239   : > { %v468_v54 = vpop.f32.mrf.mxu1 }
 0x23a PF: > { %s19_s30 = sadd.s32 1, %s591_s30  }
 0x23b   : > { %p16_p4 = scmp.ge.s32.totalorder %s19_s30, 4  }
 0x23d   :  { %18 = sbr.rel (!%p16_p4) target bundleno = 1 (0x1), region = 86 }

// kernel: transformer_forward.6
= control target key start
LH: loop header
LB: loop body
LE: loop exit
PB: predicated region body
PF: predicated region fallthrough
CT: control target
= control target key end

     0   :  { %s1150_s0 = inlined_call_operand.hbm [shape: f32[2,8,32], index: 0, kind: input, shape index: {}]   ;;  %s1151_s1 = inlined_call_operand.vmem [shape: f32[1,32], index: 1, kind: input, shape index: {}]   ;;  %s1152_s2 = inlined_call_operand.vmem [shape: f32[1,32], index: 2, kind: input, shape index: {}]   ;;  %s1153_s3 = inlined_call_operand.hbm [shape: bf16[32,192], index: 3, kind: input, shape index: {}]   ;;  %s1154_s4 = inlined_call_operand.vmem [shape: bf16[2,4,8,16], index: 4, kind: output, shape index: {0}]   ;;  %s1155_s5 = inlined_call_operand.vmem [shape: bf16[2,4,8,16], index: 5, kind: output, shape index: {1}]   ;;  %s1156_s6 = inlined_call_operand.vmem [shape: bf16[2,4,8,16], index: 6, kind: output, shape index: {2}]  }
   0x1   :  { %1157 = sst [smem:[#allocation8_spill]] %s1153_s3 }
   0x2   :  { %12 = vsyncpa [#allocation3], 0 }
   0x3   :  { %14 = vsyncpa [#allocation3 + $0x1], 0 }
   0x4   :  { %15 = vsyncpa [#allocation5], 0  ;;  %s991_s21 = smov 0   ;;  %s993_s22 = smov 0  }
   0x5   :  { %s995_s23 = smov 0   ;;  %s997_s24 = smov 0  }
   0x6   :  { %s999_s25 = smov 0   ;;  %s1001_s26 = smov 0  }
   0x7 LB: > { %s695_s27 = sadd.s32 4294967295, %s943_s26   ;;  %p697_p0 = scmp.ge.s32.totalorder %s943_s26, 1  ;;  %s943_s26 = sphi %s1001_s26, %s21_s26   ;;  %s939_s25 = sphi %s999_s25, %s1167_s25   ;;  %s935_s24 = sphi %s997_s24, %s1166_s24   ;;  %s931_s23 = sphi %s995_s23, %s1165_s23   ;;  %s927_s22 = sphi %s993_s22, %s1164_s22   ;;  %s923_s21 = sphi %s991_s21, %s1163_s21  }
   0x8   : > { %p1023_p1 = scmp.eq.s32.totalorder %s695_s27, 0  ;;  %p213_p2 = scmp.lt.s32.totalorder %s943_s26, 3 }
   0x9   : > { %s1159_s3 = sld [smem:[#allocation8_spill]]  ;;  %s945_s9 = smov [#allocation4]  }
   0xa   : > { %p1031_p3 = pnand %p697_p0, %p213_p2  ;;  %s232_s10 = sshll.u32 %s945_s9, 4  ;;  %s233_s10 = int_to_ptr.vmem [resolvable:$true] %s232_s10 }
   0xb   : > { %s946_s11 = smov 128   ;;  %s947_s12 = smov 8  }
   0xc   : > { %p753_p4 = pneg %p1031_p3  ;;  %s33_s13 = sadd.s32 1, %s939_s25 }
   0xd   : > { %p35_p6 = scmp.ge.s32.totalorder %s33_s13, 2  ;;  %p49_p7 = scmp.ne.s32.totalorder %s931_s23, %s927_s22 }
   0xe   : > { %p754_p5 = pnand %p753_p4, %p1023_p1  ;;  %p50_p8 = scmp.eq.s32.totalorder %s943_s26, 0 }
   0xf   : > { %s230_s7 = sshll.u32 %s1159_s3, 4  ;;  %s1169_s13 = smov (%p35_p6, %s33_s13), 0  ;;  %s231_s7 = int_to_ptr.hbm [resolvable:$true] %s230_s7 }
  0x10   : > { %756 = dma.hbm_to_vmem [thread:$0]  (!%p754_p5), %s231_s7, 512, %s233_s10, [#allocation5], %s946_s11, %s946_s11, %s947_s12  }
  0x11   : > { %s42_s14 = sadd.s32 1, %s931_s23  ;;  %p55_p9 = scmp.ne.s32.totalorder %s927_s22, %s923_s21 }
  0x12   : > { %s37_s15 = ssub.s32 %s939_s25, %s1169_s13  ;;  %p1050_p10 = por %p50_p8, %p49_p7 }
  0x13   : > { %p40_p11 = scmp.eq.s32.totalorder %s37_s15, 0  ;;  %p1056_p12 = por %p1023_p1, %p55_p9 }
  0x14   : > { %s246_s18 = sand.u32 1, %s931_s23   ;;  %s701_s19 = sshll.u32 %s939_s25, 3 }
  0x15   : > { %s1063_s20 = scalar_select %p40_p11, %s931_s23, %s42_s14  }
  0x16   : > { %p762_p13 = scmp.lt.s32.totalorder %s943_s26, 2  ;;  %s700_s27 = sshll.u32 %s246_s18, 3 }
  0x17   : > { %s255_s30 = scalar_lea.hbm %s1150_s0, %s701_s19  ;;  %s250_s9 = scalar_lea.vmem [#allocation2], %s700_s27 }
  0x18   : > { %s257_s7 = sshll.u32 %s255_s30, 4  ;;  %s259_s10 = sshll.u32 %s250_s9, 4  ;;  %s258_s7 = int_to_ptr.hbm [resolvable:$true] %s257_s7  ;;  %s260_s10 = int_to_ptr.vmem [resolvable:$true] %s259_s10 }
  0x19   : > { %p758_p0 = pnand %p762_p13, %p1050_p10  ;;  %s247_s11 = scalar_lea.sflag [#allocation3], %s246_s18 }
  0x1a   : > { %268 = sbr.rel (%p1031_p3) target bundleno = 566 (0x236), region = 36  ;;  %s270_s12 = sand.u32 (!%p1031_p3), 1, %s927_s22  }
  0x1b   : > { %760 = dma.hbm_to_vmem [thread:$0]  (!%p758_p0), %s258_s7, 128, %s260_s10, %s247_s11  }
  0x1c   : > { %s703_s14 = sshll.u32 (!%p1031_p3), %s270_s12, 3  ;;  %s271_s15 = scalar_lea.sflag (!%p1031_p3), [#allocation3], %s270_s12 }
  0x1d   : > { %s274_s3 = scalar_lea.vmem (!%p1031_p3), [#allocation2], %s703_s14 }
  0x1f   : > { %914 = dma.done.wait (%p1056_p12), %s271_s15, 128  }
  0x20   : > { %916 = vsyncadd (%p1056_p12), %s271_s15, 4294967168 }
  0x21   : > { %918 = dma.done.wait (%p1023_p1), [#allocation5], 512  }
  0x22   : > { %920 = vsyncadd (%p1023_p1), [#allocation5], 4294966784  ;;  %vm354_vm0 = vcmask 261120   ;;  %v353_v0 = vld [vmem:[%s274_s3] sm:$0xff]  ;;  %v948_v2 = vmov 32.0   ;;  %p328_p1 = scmp.lt.s32.totalorder %s935_s24, 1 }
  0x23   : > { %v355_v1 = vsel %vm354_vm0, %v353_v0, 0.0  ;;  %825 = vrcp.f32 %v948_v2  ;;  %v721_v14 = vld [vmem:[#allocation4 + $0x10] sm:$0xf]  ;;  %v746_v15 = vld [vmem:[#allocation4 + $0x14] sm:$0xf0]  ;;  %vm449_vm5 = vcmask 125952  }
  0x24   : > { %356 = vadd.xlane.f32.xlu0 %v355_v1  ;;  %v745_v16 = vld [vmem:[#allocation4 + $0x14] sm:$0xf]  ;;  %v722_v17 = vor.u32 %v746_v15, %v721_v14  ;;  %v723_v18 = vld [vmem:[#allocation4 + $0x18] sm:$0xf0]  ;;  %v713_v19 = vld [vmem:[#allocation4] sm:$0xf] }
  0x25   : > { %v744_v20 = vld [vmem:[#allocation4 + $0x4] sm:$0xf0]  ;;  %v726_v21 = vor.u32 %v745_v16, %v723_v18  ;;  %v743_v22 = vld [vmem:[#allocation4 + $0x4] sm:$0xf]  ;;  %v715_v23 = vld [vmem:[#allocation4 + $0x8] sm:$0xf0] }
  0x26   : > { %428 = vmatpush.bf16.msra.mxu0 %v722_v17  ;;  %v714_v24 = vor.u32 %v744_v20, %v713_v19  ;;  %v718_v25 = vor.u32 %v743_v22, %v715_v23  ;;  %v823_v35 = vld [vmem:[%s1151_s1] ss:$0 sm:$0xff]  ;;  %s1171_s24 = smov (!%p328_p1, %s935_s24), 1  ;;  %s950_s7 = smov 80  }
  0x27   : > { %441 = vmatpush.bf16.msra.mxu1 %v726_v21  ;;  %v824_v38 = vld [vmem:[%s1152_s2] ss:$0 sm:$0xff]  ;;  %s1094_s17 = sshll.u32 %s1171_s24, 4  ;;  %s949_s24 = smov 48  }
  0x28   : > { %s1100_s27 = scalar_lea.vmem %s1154_s4, %s1094_s17  ;;  %s1106_s30 = scalar_lea.vmem %s1156_s6, %s1094_s17 }
  0x29   : > { %v826_v3 = vpop.eup %825  ;;  %s951_s9 = smov 112   ;;  %s952_s10 = smov 64  }
  0x2a   : > { %v359_v4 = vmul.f32 32.0, %v826_v3  ;;  %vm363_vm1 = vweird.f32 %v826_v3  ;;  %429 = vmatpush.bf16.msra.mxu0 %v714_v24  ;;  %s953_s11 = smov 96   ;;  %s954_s12 = smov 16  }
  0x2b   : > { %442 = vmatpush.bf16.msra.mxu1 %v718_v25  ;;  %s955_s14 = smov 32   ;;  %s343_s28 = scalar_lea.vmem %s1155_s5, %s1094_s17 }
  0x2c   : > { %v360_v5 = vsub.f32 1.0, %v359_v4 }
  0x2e   : > { %v361_v6 = vmul.f32 %v826_v3, %v360_v5 }
  0x30   : > { %v362_v7 = vadd.f32 %v826_v3, %v361_v6 }
  0x32   : > { %v364_v8 = vsel %vm363_vm1, %v826_v3, %v362_v7 }
  0x97   : > { %v357_v9 = vpop.xlane.xlu0 %356 }
  0x98   : > { %v365_v10 = vmul.f32 %v364_v8, %v357_v9 }
  0x9a   : > { %v366_v11 = vsub.f32 %v353_v0, %v365_v10 }
  0x9c   : > { %v367_v12 = vmul.f32 %v366_v11, %v366_v11 }
  0x9e   : > { %v368_v13 = vsel %vm354_vm0, %v367_v12, 0.0 }
  0x9f   : > { %369 = vadd.xlane.f32.xlu0 %v368_v13 }
 0x112   : > { %v370_v26 = vpop.xlane.xlu0 %369 }
 0x113   : > { %v371_v27 = vmul.f32 %v370_v26, %v364_v8 }
 0x115   : > { %v372_v28 = vadd.f32 1e-05, %v371_v27 }
 0x117   : > { %827 = vrsqrt.f32 %v372_v28  ;;  %vm379_vm3 = vweird.f32 %v372_v28 }
 0x11d   : > { %v828_v29 = vpop.eup %827 }
 0x11e   : > { %v374_v30 = vmul.f32 %v828_v29, %v372_v28  ;;  %vm380_vm2 = vweird.f32 %v828_v29 }
 0x11f   : > { %vm381_vm4 = vmor %vm379_vm3, %vm380_vm2 }
 0x120   : > { %v375_v31 = vmul.f32 %v828_v29, %v374_v30 }
 0x122   : > { %v376_v32 = vmul.f32 0.5, %v375_v31 }
 0x124   : > { %v377_v33 = vsub.f32 1.5, %v376_v32 }
 0x126   : > { %v378_v34 = vmul.f32 %v828_v29, %v377_v33 }
 0x128   : > { %v382_v36 = vsel %vm381_vm4, %v828_v29, %v378_v34 }
 0x129   : > { %v383_v37 = vmul.f32 %v382_v36, %v366_v11 }
 0x12b   : > { %v388_v39 = vmul.f32 %v823_v35, %v383_v37 }
 0x12d   : > { %v393_v40 = vadd.f32 %v824_v38, %v388_v39 }
 0x12f   : > { %v394_v41 = vpack.c.bf16 %v393_v40, %v393_v40 }
 0x131   : > { %727 = vmatmul.msk.bf16.vlgmr.msra.gmra.mxu0 %vm354_vm0, %v394_v41  ;;  %728 = vmatmul.msk.bf16.vlgmr.msra.gmra.mxu1 %vm354_vm0, %v394_v41 }
 0x1ae   : > { %v431_v42 = vpop.f32.mrf.mxu0  ;;  %v444_v43 = vpop.f32.mrf.mxu1 }
 0x1af   : > { %v448_v44 = vpack.c.bf16 %v444_v43, %v431_v42 }
 0x1b1   : > { %464 = vrot.lane.b32.xlu0 %v448_v44, %s949_s24  ;;  %487 = vrot.lane.b32.xlu2 %v448_v44, %s950_s7  ;;  %450 = vst.msk [vmem:[%s1100_s27] sm:$0xf] %vm449_vm5, %v448_v44  ;;  %v456_v45 = vrot.slane %v448_v44, 4 }
 0x1b2   : > { %459 = vrot.lane.b32.xlu1 %v448_v44, %s951_s9 }
 0x1b3   : > { %458 = vst.msk [vmem:[%s1106_s30] sm:$0xf] %vm449_vm5, %v456_v45 }
 0x1b6   : > { %v433_v46 = vpop.f32.mrf.mxu0  ;;  %v446_v47 = vpop.f32.mrf.mxu1 }
 0x1b9   : > { %452 = vrot.lane.b32.xlu2 %v448_v44, %s952_s10 }
 0x1ba   : > { %473 = vrot.lane.b32.xlu1 %v448_v44, %s953_s11 }
 0x1c1   : > { %492 = vrot.lane.b32.xlu2 %v448_v44, %s954_s12 }
 0x1c2   : > { %478 = vrot.lane.b32.xlu1 %v448_v44, %s955_s14 }
 0x20b   : > { %v488_v48 = vpop.permute.xlu2 %487 }
 0x20c   : > { %735 = vst.msk [vmem:[%s1100_s27 + $0xc] sm:$0xf] %vm449_vm5, %v488_v48  ;;  %v497_v49 = vrot.slane %v488_v48, 4 }
 0x20e   : > { %737 = vst.msk [vmem:[%s1106_s30 + $0xc] sm:$0xf] %vm449_vm5, %v497_v49 }
 0x213   : > { %v453_v50 = vpop.permute.xlu2 %452 }
 0x214   : > { %455 = vst.msk [vmem:[%s343_s28] sm:$0xf] %vm449_vm5, %v453_v50 }
 0x21b   : > { %v493_v51 = vpop.permute.xlu2 %492 }
 0x21c   : > { %736 = vst.msk [vmem:[%s343_s28 + $0xc] sm:$0xf] %vm449_vm5, %v493_v51 }
 0x223   : > { %v465_v52 = vpop.permute.xlu0 %464 }
 0x224   : > { %730 = vst.msk [vmem:[%s343_s28 + $0x4] sm:$0xf] %vm449_vm5, %v465_v52  ;;  %v460_v53 = vpop.permute.xlu1 %459 }
 0x225   : > { %729 = vst.msk [vmem:[%s1100_s27 + $0x4] sm:$0xf] %vm449_vm5, %v460_v53  ;;  %v469_v54 = vrot.slane %v460_v53, 4 }
 0x227   : > { %731 = vst.msk [vmem:[%s1106_s30 + $0x4] sm:$0xf] %vm449_vm5, %v469_v54 }
 0x22c   : > { %v474_v55 = vpop.permute.xlu1 %473 }
 0x22d   : > { %732 = vst.msk [vmem:[%s1100_s27 + $0x8] sm:$0xf] %vm449_vm5, %v474_v55  ;;  %v483_v56 = vrot.slane %v474_v55, 4 }
 0x22f   : > { %734 = vst.msk [vmem:[%s1106_s30 + $0x8] sm:$0xf] %vm449_vm5, %v483_v56 }
 0x234   : > { %v479_v57 = vpop.permute.xlu1 %478 }
 0x235   : > { %733 = vst.msk [vmem:[%s343_s28 + $0x8] sm:$0xf] %vm449_vm5, %v479_v57 }
 0x236 PF: > { %s21_s26 = sadd.s32 1, %s943_s26   ;;  %s1163_s21 = smov %s927_s22 }
 0x237   : > { %p18_p2 = scmp.ge.s32.totalorder %s21_s26, 4   ;;  %s1164_s22 = smov %s931_s23 }
 0x238   : > { %s1165_s23 = smov %s1063_s20  ;;  %s1166_s24 = smov %s939_s25 }
 0x239   : > { %s1167_s25 = smov %s1169_s13  ;;  %20 = sbr.rel (!%p18_p2) target bundleno = 7 (0x7), region = 113 }
 0x23e   :  { %572 = vsyncpa [#allocation3], 1 }
 0x23f   :  { %574 = vsyncpa [#allocation3 + $0x1], 1 }
 0x240   :  { %575 = vsyncpa [#allocation5], 1 }

// kernel: transformer_forward.7
= control target key start
LH: loop header
LB: loop body
LE: loop exit
PB: predicated region body
PF: predicated region fallthrough
CT: control target
= control target key end

     0   :  { %s1115_s21 = smov 0   ;;  %s1117_s22 = smov 0   ;;  %s1269_s0 = inlined_call_operand.vmem [shape: f32[2,8,32], index: 0, kind: input, shape index: {}]   ;;  %s1270_s1 = inlined_call_operand.vmem [shape: bf16[2,4,8,16], index: 1, kind: input, shape index: {}]   ;;  %s1271_s2 = inlined_call_operand.vmem [shape: bf16[2,4,8,16], index: 2, kind: input, shape index: {}]   ;;  %s1272_s3 = inlined_call_operand.vmem [shape: bf16[2,4,8,16], index: 3, kind: input, shape index: {}]   ;;  %s1273_s4 = inlined_call_operand.vmem [shape: bf16[64,32], index: 4, kind: input, shape index: {}]   ;;  %s1274_s5 = inlined_call_operand.vmem [shape: f32[1,32], index: 5, kind: input, shape index: {}]   ;;  %s1275_s6 = inlined_call_operand.vmem [shape: f32[2,8,32], index: 6, kind: output, shape index: {}]  }
   0x1   :  { %s1119_s23 = smov 0  }
   0x2 LB: > { %s35_s24 = sadd.s32 1, %s1068_s22  ;;  %p949_p0 = scmp.ge.s32.totalorder %s1072_s23, 1  ;;  %s1072_s23 = sphi %s1119_s23, %s16_s23   ;;  %s1068_s22 = sphi %s1117_s22, %s1277_s22   ;;  %s1064_s21 = sphi %s1115_s21, %s1276_s21  }
   0x3   : > { %p37_p1 = scmp.ge.s32.totalorder %s35_s24, 2  ;;  %p282_p2 = scmp.lt.s32.totalorder %s1072_s23, 3 }
   0x5   : > { %s1279_s24 = smov (%p37_p1, %s35_s24), 0  ;;  %p283_p3 = pnand %p949_p0, %p282_p2 }
   0x6   : > { %p340_p4 = scmp.lt.s32.totalorder (!%p283_p3), %s1064_s21, 1  ;;  %s1077_s11 = smov (!%p283_p3), 32  }
   0x7   : > { %286 = sbr.rel (%p283_p3) target bundleno = 965 (0x3c5), region = 44  ;;  %s1078_s12 = smov (!%p283_p3), 16  }
   0x8   : > { %s1079_s13 = smov (!%p283_p3), 48  }
   0xc   : > { %s1281_s21 = smov (!%p340_p4, %s1064_s21), 1  ;;  %vm392_vm0 = vcmask 130048   ;;  %vm383_vm1 = vcmask 7168   ;;  %v1074_v11 = vmov -inf   ;;  %vm490_vm2 = vcmask 64512  }
   0xd   : > { %s1136_s25 = sshll.u32 %s1281_s21, 4  ;;  %385 = vst.msk [vmem:[#allocation2 + $0x8] sm:$0xff] %vm383_vm1, %v1074_v11  ;;  %v1075_v22 = vmov 0   ;;  %v1076_v23 = vmov 0.0   ;;  %vm587_vm3 = vcmask 1043456   ;;  %vm753_vm4 = vcmask 261120  }
   0xe   : > { %s362_s28 = scalar_lea.vmem %s1271_s2, %s1136_s25  ;;  %s354_s7 = scalar_lea.vmem %s1270_s1, %s1136_s25  ;;  %384 = vst.msk [vmem:[#allocation2] sm:$0xff] %vm383_vm1, %v1074_v11  ;;  %1024 = vset.pattern.permute.xlu0 %v1075_v22  ;;  %1022 = vset.pattern.permute.xlu1 %v1075_v22  ;;  %vm755_vm5 = vcmask 392192   ;;  %vm794_vm6 = vcmask 523264  }
   0xf   : > { %v402_v0 = vld [vmem:[%s362_s28 + $0x4] sm:$0xf]  ;;  %v403_v1 = vld [vmem:[%s362_s28 + $0x8] sm:$0xf]  ;;  %v404_v2 = vld [vmem:[%s362_s28 + $0xc] sm:$0xf]  ;;  %1023 = vset.pattern.permute.xlu2 %v1075_v22  ;;  %s1199_s10 = scalar_lea.vmem %s1272_s3, %s1136_s25 }
  0x10   : > { %v433_v3 = vsel %vm392_vm0, %v402_v0, 0  ;;  %v452_v4 = vsel %vm392_vm0, %v403_v1, 0  ;;  %v471_v5 = vsel %vm392_vm0, %v404_v2, 0  ;;  %v398_v6 = vld [vmem:[%s354_s7 + $0x4] sm:$0xf]  ;;  %386 = vst.msk [vmem:[#allocation2 + $0x10] sm:$0xff] %vm383_vm1, %v1074_v11 }
  0x11   : > { %442 = vmatpush.bf16.xpose.msra.mxu1 %v433_v3  ;;  %461 = vmatpush.bf16.xpose.msra.mxu2 %v452_v4  ;;  %v399_v7 = vld [vmem:[%s354_s7 + $0x8] sm:$0xf]  ;;  %v400_v8 = vld [vmem:[%s354_s7 + $0xc] sm:$0xf]  ;;  %v401_v9 = vld [vmem:[%s362_s28] sm:$0xf] }
  0x12   : > { %480 = vmatpush.bf16.xpose.msra.mxu3 %v471_v5  ;;  %v414_v10 = vsel %vm392_vm0, %v401_v9, 0  ;;  %387 = vst.msk [vmem:[#allocation2 + $0x18] sm:$0xff] %vm383_vm1, %v1074_v11  ;;  %v397_v12 = vld [vmem:[%s354_s7] sm:$0xf]  ;;  %v408_v39 = vld [vmem:[%s1199_s10 + $0xc] sm:$0xf] }
  0x13   : > { %423 = vmatpush.bf16.xpose.msra.mxu0 %v414_v10  ;;  %391 = vst.msk [vmem:[#allocation3 + $0x18] sm:$0xff] %vm383_vm1, %v1076_v23  ;;  %v646_v40 = vsel %vm587_vm3, %v408_v39, 0  ;;  %v406_v41 = vld [vmem:[%s1199_s10 + $0x4] sm:$0xf]  ;;  %v407_v43 = vld [vmem:[%s1199_s10 + $0x8] sm:$0xf] }
  0x14   : > { %388 = vst.msk [vmem:[#allocation3] sm:$0xff] %vm383_vm1, %v1076_v23  ;;  %v1175_v24 = vld [vmem:[#allocation2 + $0x8] sm:$0xff]  ;;  %v608_v42 = vsel %vm587_vm3, %v406_v41, 0  ;;  %v627_v44 = vsel %vm587_vm3, %v407_v43, 0  ;;  %s950_s26 = sshll.u32 %s1281_s21, 3 }
  0x15   : > { %389 = vst.msk [vmem:[#allocation3 + $0x8] sm:$0xff] %vm383_vm1, %v1076_v23  ;;  %v486_v62 = vld [vmem:[#allocation2] sm:$0xff]  ;;  %s346_s29 = scalar_lea.vmem %s1269_s0, %s950_s26 }
  0x16   : > { %390 = vst.msk [vmem:[#allocation3 + $0x10] sm:$0xff] %vm383_vm1, %v1076_v23 }
  0x17   : > { %393 = vst.msk [vmem:[#allocation4] sm:$0xff] %vm392_vm0, %v1076_v23  ;;  %v1187_v29 = vld [vmem:[#allocation2 + $0x10] sm:$0xff] }
  0x18   : > { %959 = vmatmul.msk.bf16.vlgmr.msra.gmra.mxu1 %vm392_vm0, %v398_v6  ;;  %960 = vmatmul.msk.bf16.vlgmr.msra.gmra.mxu2 %vm392_vm0, %v399_v7  ;;  %394 = vst.msk [vmem:[#allocation4 + $0x8] sm:$0xff] %vm392_vm0, %v1076_v23 }
  0x19   : > { %961 = vmatmul.msk.bf16.vlgmr.msra.gmra.mxu3 %vm392_vm0, %v400_v8  ;;  %395 = vst.msk [vmem:[#allocation4 + $0x10] sm:$0xff] %vm392_vm0, %v1076_v23  ;;  %v489_v34 = vld [vmem:[#allocation2 + $0x18] sm:$0xff]  ;;  %617 = vmatpush.bf16.msrb.mxu1 %v608_v42 }
  0x1a   : > { %958 = vmatmul.msk.bf16.vlgmr.msra.gmra.mxu0 %vm392_vm0, %v397_v12  ;;  %396 = vst.msk [vmem:[#allocation4 + $0x18] sm:$0xff] %vm392_vm0, %v1076_v23  ;;  %655 = vmatpush.bf16.msrb.mxu3 %v646_v40  ;;  %v570_v5 = vld [vmem:[#allocation3 + $0x18] sm:$0xff] }
  0x1b   : > { %636 = vmatpush.bf16.msrb.mxu2 %v627_v44 }
  0x1c   : > { %v568_v39 = vld [vmem:[#allocation3 + $0x8] sm:$0xff] }
  0x1d   : > { %v569_v12 = vld [vmem:[#allocation3 + $0x10] sm:$0xff] }
  0x95   : > { %v1158_v13 = vpop.f32.mrf.mxu1 }
  0x96   : > { %v494_v14 = vsel %vm490_vm2, %v1158_v13, -inf }
  0x97   : > { %495 = vmax.xlane.f32.xlu1 %v494_v14  ;;  %v1180_v27 = vpop.f32.mrf.mxu0 }
  0x98   : > { %v491_v38 = vsel %vm490_vm2, %v1180_v27, -inf }
  0x9b   : > { %v1162_v15 = vpop.f32.mrf.mxu2 }
  0x9c   : > { %v482_v16 = vpop.f32.mrf.mxu3  ;;  %v497_v17 = vsel %vm490_vm2, %v1162_v15, -inf }
  0x9d   : > { %498 = vmax.xlane.f32.xlu0 %v497_v17  ;;  %v446_v18 = vpop.f32.mrf.mxu1  ;;  %v500_v19 = vsel %vm490_vm2, %v482_v16, -inf }
  0x9f   : > { %v427_v33 = vpop.f32.mrf.mxu0 }
  0xa3   : > { %v465_v20 = vpop.f32.mrf.mxu2 }
  0xa4   : > { %v484_v21 = vpop.f32.mrf.mxu3 }
  0xa5   : > { %501 = vmax.xlane.f32.xlu0 %v500_v19  ;;  %v405_v21 = vld [vmem:[%s1199_s10] sm:$0xf]  ;;  %s377_s10 = scalar_lea.vmem %s1275_s6, %s950_s26 }
  0xa6   : > { %v589_v23 = vsel %vm587_vm3, %v405_v21, 0 }
  0xa7   : > { %598 = vmatpush.bf16.msrb.mxu0 %v589_v23 }
 0x10a   : > { %v496_v25 = vpop.xlane.xlu1 %495 }
 0x10b   : > { %v1178_v26 = vmax.f32 %v1175_v24, %v496_v25 }
 0x10d   : > { %v508_v28 = vsub.f32 %v1175_v24, %v1178_v26  ;;  %698 = vst.msk [vmem:[#allocation2 + $0x8] sm:$0xff] %vm383_vm1, %v1178_v26  ;;  %526 = vperm.xlu0 %1024, %v1178_v26  }
 0x110   : > { %v499_v30 = vpop.xlane.xlu0 %498 }
 0x111   : > { %v505_v31 = vmax.f32 %v1187_v29, %v499_v30 }
 0x113   : > { %v509_v32 = vsub.f32 %v1187_v29, %v505_v31  ;;  %699 = vst.msk [vmem:[#allocation2 + $0x10] sm:$0xff] %vm383_vm1, %v505_v31  ;;  %531 = vperm.xlu1 %1022, %v505_v31  }
 0x115   : > { %v515_v6 = vmul.f32 1.442695, %v509_v32 }
 0x118   : > { %v502_v35 = vpop.xlane.xlu0 %501 }
 0x119   : > { %v506_v36 = vmax.f32 %v489_v34, %v502_v35 }
 0x11b   : > { %v510_v37 = vsub.f32 %v489_v34, %v506_v36  ;;  %700 = vst.msk [vmem:[#allocation2 + $0x18] sm:$0xff] %vm383_vm1, %v506_v36  ;;  %536 = vperm.xlu2 %1023, %v506_v36  }
 0x11d   : > { %v517_v3 = vmul.f32 1.442695, %v510_v37  ;;  %v513_v37 = vmul.f32 1.442695, %v508_v28 }
 0x144   : > { %492 = vmax.xlane.f32.xlu2 %v491_v38 }
 0x175   : > { %v537_v45 = vpop.permute.xlu2 %536 }
 0x176   : > { %v542_v46 = vsub.f32 %v482_v16, %v537_v45  ;;  %v663_v45 = vld [vmem:[#allocation4 + $0x10] sm:$0xff] }
 0x178   : > { %v549_v47 = vmul.f32 1.442695, %v542_v46 }
 0x17a   : > { %1026 = vpow2.f32 %v549_v47 }
 0x17f   : > { %v527_v48 = vpop.permute.xlu0 %526 }
 0x180   : > { %v1027_v49 = vpop.eup %1026  ;;  %v540_v50 = vsub.f32 %v1158_v13, %v527_v48 }
 0x181   : > { %v560_v51 = vsel %vm490_vm2, %v1027_v49, 0.0  ;;  %v566_v52 = vpack.c.bf16 %v1027_v49, %v1027_v49 }
 0x182   : > { %v545_v53 = vmul.f32 1.442695, %v540_v50  ;;  %561 = vadd.xlane.f32.xlu0 %v560_v51  ;;  %v567_v50 = vld [vmem:[#allocation3] sm:$0xff] }
 0x183   : > { %965 = vmatmul.msk.bf16.vlgmr.msrb.gmra.mxu3 %vm490_vm2, %v566_v52 }
 0x184   : > { %1028 = vpow2.f32 %v545_v53 }
 0x185   : > { %v532_v54 = vpop.permute.xlu1 %531 }
 0x186   : > { %v541_v55 = vsub.f32 %v1162_v15, %v532_v54  ;;  %v662_v54 = vld [vmem:[#allocation4 + $0x8] sm:$0xff] }
 0x188   : > { %v547_v56 = vmul.f32 1.442695, %v541_v55  ;;  %v661_v55 = vld [vmem:[#allocation4] sm:$0xff] }
 0x18a   : > { %v1029_v57 = vpop.eup %1028  ;;  %1030 = vpow2.f32 %v547_v56 }
 0x18b   : > { %v564_v58 = vpack.c.bf16 %v1029_v57, %v1029_v57  ;;  %v554_v2 = vsel %vm490_vm2, %v1029_v57, 0.0  ;;  %1032 = vpow2.f32 %v517_v3 }
 0x18c   : > { %1034 = vpow2.f32 %v515_v6 }
 0x18d   : > { %963 = vmatmul.msk.bf16.vlgmr.msrb.gmra.mxu1 %vm490_vm2, %v564_v58 }
 0x190   : > { %v1031_v59 = vpop.eup %1030 }
 0x191   : > { %v557_v60 = vsel %vm490_vm2, %v1031_v59, 0.0  ;;  %v565_v61 = vpack.c.bf16 %v1031_v59, %v1031_v59  ;;  %v1033_v4 = vpop.eup %1032 }
 0x192   : > { %558 = vadd.xlane.f32.xlu2 %v557_v60  ;;  %v574_v7 = vmul.f32 %v1033_v4, %v570_v5  ;;  %v1035_v11 = vpop.eup %1034 }
 0x193   : > { %964 = vmatmul.msk.bf16.vlgmr.msrb.gmra.mxu2 %vm490_vm2, %v565_v61  ;;  %v573_v14 = vmul.f32 %v1035_v11, %v569_v12  ;;  %v991_v12 = vld [vmem:[%s1273_s4 + $0x18] sm:$0xff] }
 0x194   : > { %802 = vmatpush.bf16.msra.mxu0 %v991_v12 }
 0x1b7   : > { %v493_v63 = vpop.xlane.xlu2 %492 }
 0x1b8   : > { %v503_v0 = vmax.f32 %v486_v62, %v493_v63 }
 0x1ba   : > { %v507_v1 = vsub.f32 %v486_v62, %v503_v0  ;;  %697 = vst.msk [vmem:[#allocation2] sm:$0xff] %vm383_vm1, %v503_v0  ;;  %521 = vperm.xlu1 %1022, %v503_v0   ;;  %v664_v0 = vld [vmem:[#allocation4 + $0x18] sm:$0xff] }
 0x1bc   : > { %v511_v10 = vmul.f32 1.442695, %v507_v1 }
 0x1be   : > { %1036 = vpow2.f32 %v511_v10 }
 0x1c4   : > { %v1037_v13 = vpop.eup %1036 }
 0x1c5   : > { %v571_v51 = vmul.f32 %v1037_v13, %v567_v50 }
 0x1e4   : > { %555 = vadd.xlane.f32.xlu1 %v554_v2 }
 0x1f5   : > { %v562_v8 = vpop.xlane.xlu0 %561 }
 0x1f6   : > { %v578_v9 = vadd.f32 %v574_v7, %v562_v8 }
 0x1f8   : > { %583 = vst.msk [vmem:[#allocation3 + $0x18] sm:$0xff] %vm383_vm1, %v578_v9 }
 0x1fd   : > { %677 = vperm.xlu1 %1022, %v1035_v11  }
 0x1ff   : > { %v707_v43 = vld [vmem:[#allocation3 + $0x18] sm:$0xff] }
 0x205   : > { %667 = vperm.xlu1 %1022, %v1037_v13   ;;  %v559_v15 = vpop.xlane.xlu2 %558  ;;  %v990_v13 = vld [vmem:[%s1273_s4 + $0x10] sm:$0xff] }
 0x206   : > { %v577_v16 = vadd.f32 %v573_v14, %v559_v15  ;;  %v1217_v17 = vpop.f32.mrf.mxu3  ;;  %803 = vmatpush.bf16.msra.mxu0 %v990_v13  ;;  %v989_v14 = vld [vmem:[%s1273_s4 + $0x8] sm:$0xff]  ;;  %v988_v15 = vld [vmem:[%s1273_s4] sm:$0xff] }
 0x208   : > { %582 = vst.msk [vmem:[#allocation3 + $0x10] sm:$0xff] %vm383_vm1, %v577_v16 }
 0x20a   : > { %v619_v18 = vpop.f32.mrf.mxu1  ;;  %804 = vmatpush.bf16.msra.mxu0 %v989_v14 }
 0x20e   : > { %v659_v19 = vpop.f32.mrf.mxu3  ;;  %805 = vmatpush.bf16.msra.mxu0 %v988_v15 }
 0x20f   : > { %v706_v20 = vld [vmem:[#allocation3 + $0x10] sm:$0xff] }
 0x210   : > { %1038 = vrcp.f32 %v706_v20 }
 0x212   : > { %v621_v22 = vpop.f32.mrf.mxu1 }
 0x216   : > { %v1039_v25 = vpop.eup %1038  ;;  %v638_v29 = vpop.f32.mrf.mxu2 }
 0x217   : > { %728 = vperm.xlu0 %1024, %v1039_v25  }
 0x21e   : > { %v640_v30 = vpop.f32.mrf.mxu2 }
 0x21f   : > { %v1025_v30 = vld [vmem:[%s1274_s5] ss:$0 sm:$0xff] }
 0x22c   : > { %v522_v31 = vpop.permute.xlu1 %521 }
 0x22d   : > { %v539_v32 = vsub.f32 %v1180_v27, %v522_v31 }
 0x22f   : > { %v543_v33 = vmul.f32 1.442695, %v539_v32  ;;  %v811_v32 = vld [vmem:[%s346_s29] sm:$0xff] }
 0x231   : > { %1040 = vpow2.f32 %v543_v33 }
 0x232   : > { %1042 = vpow2.f32 %v513_v37 }
 0x237   : > { %v1041_v34 = vpop.eup %1040 }
 0x238   : > { %v551_v35 = vsel %vm490_vm2, %v1041_v34, 0.0  ;;  %v563_v36 = vpack.c.bf16 %v1041_v34, %v1041_v34  ;;  %v1043_v38 = vpop.eup %1042 }
 0x239   : > { %552 = vadd.xlane.f32.xlu2 %v551_v35  ;;  %v572_v40 = vmul.f32 %v1043_v38, %v568_v39 }
 0x23a   : > { %962 = vmatmul.msk.bf16.vlgmr.msrb.gmra.mxu0 %vm490_vm2, %v563_v36 }
 0x251   : > { %672 = vperm.xlu2 %1023, %v1043_v38  }
 0x257   : > { %v556_v41 = vpop.xlane.xlu1 %555 }
 0x258   : > { %v576_v27 = vadd.f32 %v572_v40, %v556_v41 }
 0x259   : > { %682 = vperm.xlu2 %1023, %v1033_v4  }
 0x25a   : > { %581 = vst.msk [vmem:[#allocation3 + $0x8] sm:$0xff] %vm383_vm1, %v576_v27 }
 0x261   : > { %v705_v42 = vld [vmem:[#allocation3 + $0x8] sm:$0xff] }
 0x262   : > { %1044 = vrcp.f32 %v705_v42 }
 0x263   : > { %1046 = vrcp.f32 %v707_v43 }
 0x268   : > { %v1045_v44 = vpop.eup %1044 }
 0x269   : > { %723 = vperm.xlu2 %1023, %v1045_v44   ;;  %v1047_v24 = vpop.eup %1046 }
 0x26f   : > { %v678_v46 = vpop.permute.xlu1 %677 }
 0x270   : > { %v687_v26 = vmul.f32 %v678_v46, %v663_v45 }
 0x271   : > { %733 = vperm.xlu2 %1023, %v1047_v24  }
 0x272   : > { %v691_v28 = vadd.f32 %v687_v26, %v638_v29 }
 0x274   : > { %695 = vst.msk [vmem:[#allocation4 + $0x10] sm:$0xff] %vm392_vm0, %v691_v28 }
 0x277   : > { %v668_v56 = vpop.permute.xlu1 %667 }
 0x278   : > { %v685_v59 = vmul.f32 %v668_v56, %v661_v55 }
 0x27b   : > { %v714_v47 = vld [vmem:[#allocation4 + $0x10] sm:$0xff] }
 0x289   : > { %v729_v48 = vpop.permute.xlu0 %728 }
 0x28a   : > { %v738_v49 = vmul.f32 %v729_v48, %v714_v47 }
 0x28c   : > { %745 = vrot.lane.b32.xlu0 %v738_v49, %s1077_s11 }
 0x2ac   : > { %v553_v52 = vpop.xlane.xlu2 %552 }
 0x2ad   : > { %v575_v53 = vadd.f32 %v571_v51, %v553_v52 }
 0x2af   : > { %580 = vst.msk [vmem:[#allocation3] sm:$0xff] %vm383_vm1, %v575_v53 }
 0x2b4   : > { %v673_v57 = vpop.permute.xlu2 %672 }
 0x2b5   : > { %v686_v58 = vmul.f32 %v673_v57, %v662_v54 }
 0x2b6   : > { %v704_v60 = vld [vmem:[#allocation3] sm:$0xff] }
 0x2b7   : > { %v690_v61 = vadd.f32 %v686_v58, %v619_v18  ;;  %v600_v62 = vpop.f32.mrf.mxu0  ;;  %1048 = vrcp.f32 %v704_v60 }
 0x2b8   : > { %v689_v63 = vadd.f32 %v685_v59, %v600_v62 }
 0x2b9   : > { %694 = vst.msk [vmem:[#allocation4 + $0x8] sm:$0xff] %vm392_vm0, %v690_v61 }
 0x2ba   : > { %693 = vst.msk [vmem:[#allocation4] sm:$0xff] %vm392_vm0, %v689_v63 }
 0x2bc   : > { %v683_v1 = vpop.permute.xlu2 %682 }
 0x2bd   : > { %v1049_v2 = vpop.eup %1048  ;;  %v688_v3 = vmul.f32 %v683_v1, %v664_v0 }
 0x2be   : > { %718 = vperm.xlu2 %1023, %v1049_v2  }
 0x2bf   : > { %v692_v4 = vadd.f32 %v688_v3, %v1217_v17  ;;  %v602_v5 = vpop.f32.mrf.mxu0 }
 0x2c0   : > { %v713_v6 = vld [vmem:[#allocation4 + $0x8] sm:$0xff] }
 0x2c1   : > { %696 = vst.msk [vmem:[#allocation4 + $0x18] sm:$0xff] %vm392_vm0, %v692_v4  ;;  %v712_v17 = vld [vmem:[#allocation4] sm:$0xff] }
 0x2c4   : > { %v724_v7 = vpop.permute.xlu2 %723 }
 0x2c5   : > { %v737_v8 = vmul.f32 %v724_v7, %v713_v6 }
 0x2c7   : > { %741 = vrot.lane.b32.xlu1 %v737_v8, %s1078_s12 }
 0x2c8   : > { %v715_v9 = vld [vmem:[#allocation4 + $0x18] sm:$0xff] }
 0x2cc   : > { %v734_v10 = vpop.permute.xlu2 %733 }
 0x2cd   : > { %v739_v11 = vmul.f32 %v734_v10, %v715_v9 }
 0x2cf   : > { %749 = vrot.lane.b32.xlu2 %v739_v11, %s1079_s13 }
 0x2fe   : > { %v746_v20 = vpop.permute.xlu0 %745 }
 0x318   : > { %v719_v16 = vpop.permute.xlu2 %718 }
 0x319   : > { %v736_v18 = vmul.f32 %v719_v16, %v712_v17 }
 0x329   : > { %v750_v22 = vpop.permute.xlu2 %749 }
 0x339   : > { %v742_v19 = vpop.permute.xlu1 %741 }
 0x33a   : > { %v752_v21 = vsel %vm392_vm0, %v736_v18, %v742_v19 }
 0x33b   : > { %v754_v23 = vsel %vm753_vm4, %v752_v21, %v746_v20 }
 0x33c   : > { %v756_v25 = vsel %vm755_vm5, %v754_v23, %v750_v22 }
 0x33d   : > { %v757_v29 = vpack.c.bf16 %v756_v25, %v756_v25 }
 0x33f   : > { %982 = vmatmul.msk.bf16.vlgmr.msra.gmra.mxu0 %vm794_vm6, %v757_v29 }
 0x3bc   : > { %v807_v31 = vpop.f32.mrf.mxu0 }
 0x3bd   : > { %v808_v33 = vadd.f32 %v1025_v30, %v807_v31 }
 0x3bf   : > { %v812_v34 = vadd.f32 %v811_v32, %v808_v33 }
 0x3c1   : > { %813 = vst.msk [vmem:[%s377_s10] sm:$0xff] %vm753_vm4, %v812_v34 }
 0x3c4   : > { %v809_v35 = vpop.f32.mrf.mxu0 }
 0x3c5 PF: > { %s16_s23 = sadd.s32 1, %s1072_s23   ;;  %s1276_s21 = smov %s1068_s22 }
 0x3c6   : > { %p13_p5 = scmp.ge.s32.totalorder %s16_s23, 4   ;;  %s1277_s22 = smov %s1279_s24 }
 0x3c8   :  { %15 = sbr.rel (!%p13_p5) target bundleno = 2 (0x2), region = 91 }

// kernel: transformer_forward.9
= control target key start
LH: loop header
LB: loop body
LE: loop exit
PB: predicated region body
PF: predicated region fallthrough
CT: control target
= control target key end

     0   :  { %s797_s21 = smov 0   ;;  %s799_s22 = smov 0   ;;  %s903_s0 = inlined_call_operand.vmem [shape: f32[2,8,32], index: 0, kind: input, shape index: {}]   ;;  %s904_s1 = inlined_call_operand.vmem [shape: f32[1,32], index: 1, kind: input, shape index: {}]   ;;  %s905_s2 = inlined_call_operand.vmem [shape: f32[1,32], index: 2, kind: input, shape index: {}]   ;;  %s906_s3 = inlined_call_operand.vmem [shape: bf16[32,192], index: 3, kind: input, shape index: {}]   ;;  %s907_s4 = inlined_call_operand.vmem [shape: bf16[2,4,8,16], index: 4, kind: output, shape index: {0}]   ;;  %s908_s5 = inlined_call_operand.vmem [shape: bf16[2,4,8,16], index: 5, kind: output, shape index: {1}]   ;;  %s909_s6 = inlined_call_operand.vmem [shape: bf16[2,4,8,16], index: 6, kind: output, shape index: {2}]  }
   0x1   :  { %s801_s23 = smov 0  }
   0x2 LB: > { %s29_s24 = sadd.s32 1, %s748_s22  ;;  %p648_p0 = scmp.ge.s32.totalorder %s752_s23, 1  ;;  %s752_s23 = sphi %s801_s23, %s17_s23   ;;  %s748_s22 = sphi %s799_s22, %s911_s22   ;;  %s744_s21 = sphi %s797_s21, %s910_s21  }
   0x3   : > { %p31_p1 = scmp.ge.s32.totalorder %s29_s24, 2  ;;  %p239_p2 = scmp.lt.s32.totalorder %s752_s23, 3 }
   0x5   : > { %s913_s24 = smov (%p31_p1, %s29_s24), 0  ;;  %p240_p3 = pnand %p648_p0, %p239_p2 }
   0x6   : > { %p290_p4 = scmp.lt.s32.totalorder (!%p240_p3), %s744_s21, 1  ;;  %s756_s12 = smov (!%p240_p3), 80  }
   0x7   : > { %243 = sbr.rel (%p240_p3) target bundleno = 547 (0x223), region = 36  ;;  %s757_s13 = smov (!%p240_p3), 112  }
   0x8   : > { %s758_s14 = smov (!%p240_p3), 64   ;;  %s759_s15 = smov (!%p240_p3), 96  }
   0x9   : > { %s760_s16 = smov (!%p240_p3), 16   ;;  %s761_s17 = smov (!%p240_p3), 32  }
   0xc   : > { %s915_s21 = smov (!%p290_p4, %s744_s21), 1  ;;  %vm323_vm0 = vcmask 261120   ;;  %v754_v2 = vmov 32.0   ;;  %v666_v14 = vld [vmem:[%s906_s3 + $0x10] sm:$0xf]  ;;  %vm418_vm5 = vcmask 125952  }
   0xd   : > { %s649_s25 = sshll.u32 %s915_s21, 3  ;;  %726 = vrcp.f32 %v754_v2  ;;  %v691_v15 = vld [vmem:[%s906_s3 + $0x14] sm:$0xf0]  ;;  %v690_v16 = vld [vmem:[%s906_s3 + $0x14] sm:$0xf]  ;;  %s856_s29 = sshll.u32 %s915_s21, 4 }
   0xe   : > { %s296_s28 = scalar_lea.vmem %s903_s0, %s649_s25  ;;  %v667_v17 = vor.u32 %v691_v15, %v666_v14  ;;  %v668_v18 = vld [vmem:[%s906_s3 + $0x18] sm:$0xf0]  ;;  %v658_v19 = vld [vmem:[%s906_s3] sm:$0xf]  ;;  %v689_v20 = vld [vmem:[%s906_s3 + $0x4] sm:$0xf0]  ;;  %s862_s8 = scalar_lea.vmem %s907_s4, %s856_s29 }
   0xf   : > { %v322_v0 = vld [vmem:[%s296_s28] sm:$0xff]  ;;  %v671_v21 = vor.u32 %v690_v16, %v668_v18  ;;  %v660_v23 = vld [vmem:[%s906_s3 + $0x8] sm:$0xf0]  ;;  %v659_v24 = vor.u32 %v689_v20, %v658_v19  ;;  %s868_s11 = scalar_lea.vmem %s909_s6, %s856_s29  ;;  %s755_s21 = smov 48  }
  0x10   : > { %v324_v1 = vsel %vm323_vm0, %v322_v0, 0.0  ;;  %v688_v22 = vld [vmem:[%s906_s3 + $0x4] sm:$0xf]  ;;  %397 = vmatpush.bf16.msra.mxu0 %v667_v17  ;;  %v724_v35 = vld [vmem:[%s904_s1] ss:$0 sm:$0xff]  ;;  %s312_s20 = scalar_lea.vmem %s908_s5, %s856_s29 }
  0x11   : > { %325 = vadd.xlane.f32.xlu0 %v324_v1  ;;  %410 = vmatpush.bf16.msra.mxu1 %v671_v21  ;;  %v663_v25 = vor.u32 %v688_v22, %v660_v23  ;;  %v725_v38 = vld [vmem:[%s905_s2] ss:$0 sm:$0xff] }
  0x13   : > { %v727_v3 = vpop.eup %726 }
  0x14   : > { %v328_v4 = vmul.f32 32.0, %v727_v3  ;;  %vm332_vm1 = vweird.f32 %v727_v3  ;;  %398 = vmatpush.bf16.msra.mxu0 %v659_v24 }
  0x15   : > { %411 = vmatpush.bf16.msra.mxu1 %v663_v25 }
  0x16   : > { %v329_v5 = vsub.f32 1.0, %v328_v4 }
  0x18   : > { %v330_v6 = vmul.f32 %v727_v3, %v329_v5 }
  0x1a   : > { %v331_v7 = vadd.f32 %v727_v3, %v330_v6 }
  0x1c   : > { %v333_v8 = vsel %vm332_vm1, %v727_v3, %v331_v7 }
  0x84   : > { %v326_v9 = vpop.xlane.xlu0 %325 }
  0x85   : > { %v334_v10 = vmul.f32 %v333_v8, %v326_v9 }
  0x87   : > { %v335_v11 = vsub.f32 %v322_v0, %v334_v10 }
  0x89   : > { %v336_v12 = vmul.f32 %v335_v11, %v335_v11 }
  0x8b   : > { %v337_v13 = vsel %vm323_vm0, %v336_v12, 0.0 }
  0x8c   : > { %338 = vadd.xlane.f32.xlu0 %v337_v13 }
  0xff   : > { %v339_v26 = vpop.xlane.xlu0 %338 }
 0x100   : > { %v340_v27 = vmul.f32 %v339_v26, %v333_v8 }
 0x102   : > { %v341_v28 = vadd.f32 1e-05, %v340_v27 }
 0x104   : > { %728 = vrsqrt.f32 %v341_v28  ;;  %vm348_vm3 = vweird.f32 %v341_v28 }
 0x10a   : > { %v729_v29 = vpop.eup %728 }
 0x10b   : > { %v343_v30 = vmul.f32 %v729_v29, %v341_v28  ;;  %vm349_vm2 = vweird.f32 %v729_v29 }
 0x10c   : > { %vm350_vm4 = vmor %vm348_vm3, %vm349_vm2 }
 0x10d   : > { %v344_v31 = vmul.f32 %v729_v29, %v343_v30 }
 0x10f   : > { %v345_v32 = vmul.f32 0.5, %v344_v31 }
 0x111   : > { %v346_v33 = vsub.f32 1.5, %v345_v32 }
 0x113   : > { %v347_v34 = vmul.f32 %v729_v29, %v346_v33 }
 0x115   : > { %v351_v36 = vsel %vm350_vm4, %v729_v29, %v347_v34 }
 0x116   : > { %v352_v37 = vmul.f32 %v351_v36, %v335_v11 }
 0x118   : > { %v357_v39 = vmul.f32 %v724_v35, %v352_v37 }
 0x11a   : > { %v362_v40 = vadd.f32 %v725_v38, %v357_v39 }
 0x11c   : > { %v363_v41 = vpack.c.bf16 %v362_v40, %v362_v40 }
 0x11e   : > { %672 = vmatmul.msk.bf16.vlgmr.msra.gmra.mxu0 %vm323_vm0, %v363_v41  ;;  %673 = vmatmul.msk.bf16.vlgmr.msra.gmra.mxu1 %vm323_vm0, %v363_v41 }
 0x19b   : > { %v400_v42 = vpop.f32.mrf.mxu0  ;;  %v413_v43 = vpop.f32.mrf.mxu1 }
 0x19c   : > { %v417_v44 = vpack.c.bf16 %v413_v43, %v400_v42 }
 0x19e   : > { %v425_v45 = vrot.slane %v417_v44, 4  ;;  %433 = vrot.lane.b32.xlu0 %v417_v44, %s755_s21  ;;  %456 = vrot.lane.b32.xlu2 %v417_v44, %s756_s12  ;;  %419 = vst.msk [vmem:[%s862_s8] sm:$0xf] %vm418_vm5, %v417_v44 }
 0x19f   : > { %428 = vrot.lane.b32.xlu1 %v417_v44, %s757_s13 }
 0x1a0   : > { %427 = vst.msk [vmem:[%s868_s11] sm:$0xf] %vm418_vm5, %v425_v45 }
 0x1a3   : > { %v402_v46 = vpop.f32.mrf.mxu0  ;;  %v415_v47 = vpop.f32.mrf.mxu1 }
 0x1a6   : > { %421 = vrot.lane.b32.xlu2 %v417_v44, %s758_s14 }
 0x1a7   : > { %442 = vrot.lane.b32.xlu1 %v417_v44, %s759_s15 }
 0x1ae   : > { %461 = vrot.lane.b32.xlu2 %v417_v44, %s760_s16 }
 0x1af   : > { %447 = vrot.lane.b32.xlu1 %v417_v44, %s761_s17 }
 0x1f8   : > { %v457_v48 = vpop.permute.xlu2 %456 }
 0x1f9   : > { %680 = vst.msk [vmem:[%s862_s8 + $0xc] sm:$0xf] %vm418_vm5, %v457_v48  ;;  %v466_v49 = vrot.slane %v457_v48, 4 }
 0x1fb   : > { %682 = vst.msk [vmem:[%s868_s11 + $0xc] sm:$0xf] %vm418_vm5, %v466_v49 }
 0x200   : > { %v422_v50 = vpop.permute.xlu2 %421 }
 0x201   : > { %424 = vst.msk [vmem:[%s312_s20] sm:$0xf] %vm418_vm5, %v422_v50 }
 0x208   : > { %v462_v51 = vpop.permute.xlu2 %461 }
 0x209   : > { %681 = vst.msk [vmem:[%s312_s20 + $0xc] sm:$0xf] %vm418_vm5, %v462_v51 }
 0x210   : > { %v434_v52 = vpop.permute.xlu0 %433 }
 0x211   : > { %675 = vst.msk [vmem:[%s312_s20 + $0x4] sm:$0xf] %vm418_vm5, %v434_v52  ;;  %v429_v53 = vpop.permute.xlu1 %428 }
 0x212   : > { %674 = vst.msk [vmem:[%s862_s8 + $0x4] sm:$0xf] %vm418_vm5, %v429_v53  ;;  %v438_v54 = vrot.slane %v429_v53, 4 }
 0x214   : > { %676 = vst.msk [vmem:[%s868_s11 + $0x4] sm:$0xf] %vm418_vm5, %v438_v54 }
 0x219   : > { %v443_v55 = vpop.permute.xlu1 %442 }
 0x21a   : > { %677 = vst.msk [vmem:[%s862_s8 + $0x8] sm:$0xf] %vm418_vm5, %v443_v55  ;;  %v452_v56 = vrot.slane %v443_v55, 4 }
 0x21c   : > { %679 = vst.msk [vmem:[%s868_s11 + $0x8] sm:$0xf] %vm418_vm5, %v452_v56 }
 0x221   : > { %v448_v57 = vpop.permute.xlu1 %447 }
 0x222   : > { %678 = vst.msk [vmem:[%s312_s20 + $0x8] sm:$0xf] %vm418_vm5, %v448_v57 }
 0x223 PF: > { %s17_s23 = sadd.s32 1, %s752_s23   ;;  %s910_s21 = smov %s748_s22 }
 0x224   : > { %p14_p5 = scmp.ge.s32.totalorder %s17_s23, 4   ;;  %s911_s22 = smov %s913_s24 }
 0x226   :  { %16 = sbr.rel (!%p14_p5) target bundleno = 2 (0x2), region = 99 }

// kernel: transformer_forward.11
= control target key start
LH: loop header
LB: loop body
LE: loop exit
PB: predicated region body
PF: predicated region fallthrough
CT: control target
= control target key end

     0   :  { %14 = vsyncpa [#allocation3], 0  ;;  %s928_s0 = inlined_call_operand.vmem [shape: f32[16,32], index: 0, kind: input, shape index: {}]   ;;  %s929_s1 = inlined_call_operand.vmem [shape: f32[1,32], index: 1, kind: input, shape index: {}]   ;;  %s930_s2 = inlined_call_operand.vmem [shape: f32[1,32], index: 2, kind: input, shape index: {}]   ;;  %s931_s3 = inlined_call_operand.vmem [shape: bf16[32,64], index: 3, kind: input, shape index: {}]   ;;  %s932_s4 = inlined_call_operand.vmem [shape: f32[1,64], index: 4, kind: input, shape index: {}]   ;;  %s933_s5 = inlined_call_operand.vmem [shape: bf16[64,32], index: 5, kind: input, shape index: {}]   ;;  %s934_s6 = inlined_call_operand.vmem [shape: f32[1,32], index: 6, kind: input, shape index: {}]   ;;  %s935_s7 = inlined_call_operand.vmem [shape: f32[1,32], index: 7, kind: input, shape index: {}]   ;;  %s936_s8 = inlined_call_operand.vmem [shape: f32[1,32], index: 8, kind: input, shape index: {}]   ;;  %s937_s9 = inlined_call_operand.hbm [shape: f32[16,32], index: 9, kind: output, shape index: {}]  }
   0x1   :  { %16 = vsyncpa [#allocation3 + $0x1], 0  ;;  %s790_s30 = smov 0   ;;  %s792_s10 = smov 0  }
   0x2   :  { %s794_s11 = smov 0   ;;  %s796_s12 = smov 0  }
   0x3 LB: > { %s811_s13 = sadd.s32 4294967295, %s737_s12   ;;  %s579_s14 = sadd.s32 4294967294, %s737_s12   ;;  %s737_s12 = sphi %s796_s12, %s943_s12   ;;  %s733_s11 = sphi %s794_s11, %s942_s11   ;;  %s729_s10 = sphi %s792_s10, %s941_s10   ;;  %s725_s30 = sphi %s790_s30, %s940_s30  }
   0x4   : > { %s815_s15 = sadd.s32 1, %s737_s12   ;;  %s223_s16 = sadd.s32 1, %s733_s11 }
   0x5   : > { %s220_s17 = ssub.s32 %s737_s12, %s815_s15  ;;  %p233_p0 = scmp.ne.s32.totalorder %s733_s11, %s729_s10 }
   0x6   : > { %p221_p1 = scmp.eq.s32.totalorder %s220_s17, 0  ;;  %p234_p2 = scmp.eq.s32.totalorder %s811_s13, 1 }
   0x7   : > { %p239_p3 = scmp.ne.s32.totalorder %s729_s10, %s725_s30  ;;  %p240_p4 = scmp.eq.s32.totalorder %s579_s14, 1 }
   0x8   : > { %s826_s18 = scalar_select %p221_p1, %s733_s11, %s223_s16  }
   0x9   : > { %p828_p5 = por %p234_p2, %p233_p0  ;;  %p832_p6 = por %p240_p4, %p239_p3 }
   0xa   : > { %p582_p7 = scmp.ge.s32.totalorder %s737_s12, 1  ;;  %p289_p8 = scmp.lt.s32.totalorder %s737_s12, 3 }
   0xc   : > { %p290_p9 = pnand %p582_p7, %p289_p8 }
   0xd   : > { %p324_p10 = scmp.lt.s32.totalorder (!%p290_p9), %s811_s13, 1  ;;  %s612_s24 = sshll.u32 (!%p290_p9), %s811_s13, 3 }
   0xe   : > { %293 = sbr.rel (%p290_p9) target bundleno = 846 (0x34e), region = 56  ;;  %s515_s29 = scalar_lea.hbm (!%p290_p9), %s937_s9, %s612_s24 }
  0x13   : > { %s325_s21 = scalar_select %p324_p10, %s811_s13, 1  ;;  %vm330_vm0 = vcmask 261120   ;;  %v739_v2 = vmov 32.0   ;;  %v616_v14 = vld [vmem:[%s931_s3 + $0x8] sm:$0xff]  ;;  %v615_v15 = vld [vmem:[%s931_s3] sm:$0xff]  ;;  %v620_v32 = vld [vmem:[%s933_s5 + $0x18] sm:$0xff] }
  0x14   : > { %667 = vrcp.f32 %v739_v2  ;;  %400 = vmatpush.bf16.msra.mxu0 %v616_v14  ;;  %v661_v25 = vld [vmem:[%s929_s1] ss:$0 sm:$0xff]  ;;  %461 = vmatpush.bf16.msra.mxu1 %v620_v32  ;;  %v619_v33 = vld [vmem:[%s933_s5 + $0x10] sm:$0xff]  ;;  %v618_v34 = vld [vmem:[%s933_s5 + $0x8] sm:$0xff]  ;;  %vm453_vm5 = vcmask 523264  }
  0x15   : > { %s584_s22 = sshll.u32 %s325_s21, 3  ;;  %v662_v28 = vld [vmem:[%s930_s2] ss:$0 sm:$0xff]  ;;  %s519_s21 = sshll.u32 %s515_s29, 4  ;;  %s520_s21 = int_to_ptr.hbm [resolvable:$true] %s519_s21 }
  0x16   : > { %s327_s25 = scalar_lea.vmem %s928_s0, %s584_s22  ;;  %v617_v35 = vld [vmem:[%s933_s5] sm:$0xff]  ;;  %s321_s22 = sand.u32 1, %s729_s10  }
  0x17   : > { %v843_v0 = vld [vmem:[%s327_s25] sm:$0xff]  ;;  %s583_s23 = sshll.u32 %s321_s22, 3  ;;  %s505_s25 = scalar_lea.sflag [#allocation3], %s321_s22 }
  0x18   : > { %v331_v1 = vsel %vm330_vm0, %v843_v0, 0.0  ;;  %401 = vmatpush.bf16.msra.mxu0 %v615_v15  ;;  %462 = vmatpush.bf16.msra.mxu1 %v619_v33  ;;  %v663_v36 = vld [vmem:[%s932_s4] ss:$0 sm:$0xff]  ;;  %s323_s17 = scalar_lea.vmem [#allocation2], %s583_s23  ;;  %s689_s26 = sshra.s32 %s520_s21, 4  ;;  %s690_s26 = int_to_ptr.hbm [resolvable:$true] %s689_s26 }
  0x19   : > { %332 = vadd.xlane.f32.xlu0 %v331_v1  ;;  %v664_v50 = vld [vmem:[%s934_s6] ss:$0 sm:$0xff]  ;;  %s517_s13 = sshll.u32 %s323_s17, 4  ;;  %s691_s24 = scalar_lea.hbm %s690_s26, 8  ;;  %s518_s13 = int_to_ptr.vmem [resolvable:$true] %s517_s13 }
  0x1a   : > { %v668_v3 = vpop.eup %667  ;;  %p692_p11 = scmp.ne.s32.totalorder %s690_s26, %s691_s24  ;;  %s695_s23 = scalar_lea.hbm %s937_s9, 16 }
  0x1b   : > { %v335_v4 = vmul.f32 32.0, %v668_v3  ;;  %vm339_vm1 = vweird.f32 %v668_v3  ;;  %p696_p0 = scmp.lt.s32.totalorder %s690_s26, %s937_s9  ;;  %p697_p1 = scmp.lt.s32.totalorder %s695_s23, %s691_s24 }
  0x1c   : > { %463 = vmatpush.bf16.msra.mxu1 %v618_v34  ;;  %p693_p12 = pnand %p692_p11, %p828_p5 }
  0x1d   : > { %v336_v5 = vsub.f32 1.0, %v335_v4  ;;  %p698_p2 = por %p697_p1, %p696_p0 }
  0x1e   : > { %p694_p13 = pneg %p693_p12 }
  0x1f   : > { %v337_v6 = vmul.f32 %v668_v3, %v336_v5 }
  0x20   : > { %464 = vmatpush.bf16.msra.mxu1 %v617_v35  ;;  %p699_p3 = pnand %p698_p2, %p694_p13 }
  0x21   : > { %v338_v7 = vadd.f32 %v668_v3, %v337_v6  ;;  %v665_v6 = vld [vmem:[%s935_s7] ss:$0 sm:$0xff] }
  0x23   : > { %v847_v8 = vsel %vm339_vm1, %v668_v3, %v338_v7 }
  0x8c   : > { %v333_v9 = vpop.xlane.xlu0 %332 }
  0x8d   : > { %v341_v10 = vmul.f32 %v847_v8, %v333_v9  ;;  %v666_v9 = vld [vmem:[%s936_s8] ss:$0 sm:$0xff] }
  0x8f   : > { %v342_v11 = vsub.f32 %v843_v0, %v341_v10 }
  0x91   : > { %v343_v12 = vmul.f32 %v342_v11, %v342_v11 }
  0x93   : > { %v344_v13 = vsel %vm330_vm0, %v343_v12, 0.0 }
  0x94   : > { %345 = vadd.xlane.f32.xlu0 %v344_v13 }
 0x107   : > { %v346_v16 = vpop.xlane.xlu0 %345 }
 0x108   : > { %v347_v17 = vmul.f32 %v346_v16, %v847_v8 }
 0x10a   : > { %v348_v18 = vadd.f32 1e-05, %v347_v17 }
 0x10c   : > { %669 = vrsqrt.f32 %v348_v18  ;;  %vm355_vm3 = vweird.f32 %v348_v18 }
 0x112   : > { %v670_v19 = vpop.eup %669 }
 0x113   : > { %v350_v20 = vmul.f32 %v670_v19, %v348_v18  ;;  %vm356_vm2 = vweird.f32 %v670_v19 }
 0x114   : > { %vm357_vm4 = vmor %vm355_vm3, %vm356_vm2 }
 0x115   : > { %v351_v21 = vmul.f32 %v670_v19, %v350_v20 }
 0x117   : > { %v352_v22 = vmul.f32 0.5, %v351_v21 }
 0x119   : > { %v353_v23 = vsub.f32 1.5, %v352_v22 }
 0x11b   : > { %v354_v24 = vmul.f32 %v670_v19, %v353_v23 }
 0x11d   : > { %v358_v26 = vsel %vm357_vm4, %v670_v19, %v354_v24 }
 0x11e   : > { %v359_v27 = vmul.f32 %v358_v26, %v342_v11 }
 0x120   : > { %v364_v29 = vmul.f32 %v661_v25, %v359_v27 }
 0x122   : > { %v369_v30 = vadd.f32 %v662_v28, %v364_v29 }
 0x124   : > { %v370_v31 = vpack.c.bf16 %v369_v30, %v369_v30 }
 0x126   : > { %593 = vmatmul.msk.bf16.vlgmr.msra.gmra.mxu0 %vm330_vm0, %v370_v31 }
 0x1a3   : > { %v403_v37 = vpop.f32.mrf.mxu0 }
 0x1a4   : > { %v404_v38 = vadd.f32 %v663_v36, %v403_v37 }
 0x1a6   : > { %v408_v39 = vmul.f32 0.044715, %v404_v38  ;;  %v407_v46 = vmul.f32 0.5, %v404_v38 }
 0x1a8   : > { %v409_v40 = vmul.f32 %v408_v39, %v404_v38 }
 0x1aa   : > { %v410_v41 = vmul.f32 %v409_v40, %v404_v38 }
 0x1ab   : > { %v405_v42 = vpop.f32.mrf.mxu0 }
 0x1ac   : > { %v411_v43 = vadd.f32 %v410_v41, %v404_v38 }
 0x1ae   : > { %v412_v44 = vmul.f32 0.7978846, %v411_v43 }
 0x1b0   : > { %671 = vtanh.f32 %v412_v44 }
 0x1b6   : > { %v672_v45 = vpop.eup %671 }
 0x1b7   : > { %v414_v47 = vadd.f32 1.0, %v672_v45 }
 0x1b9   : > { %v415_v48 = vmul.f32 %v414_v47, %v407_v46 }
 0x1bb   : > { %v416_v49 = vpack.c.bf16 %v415_v48, %v415_v48 }
 0x1bd   : > { %610 = vmatmul.msk.bf16.vlgmr.msra.gmra.mxu1 %vm453_vm5, %v416_v49 }
 0x23a   : > { %v466_v51 = vpop.f32.mrf.mxu1 }
 0x23b   : > { %v467_v52 = vadd.f32 %v664_v50, %v466_v51 }
 0x23d   : > { %v470_v53 = vadd.f32 %v467_v52, %v843_v0 }
 0x23f   : > { %v471_v54 = vsel %vm330_vm0, %v470_v53, 0.0 }
 0x240   : > { %472 = vadd.xlane.f32.xlu1 %v471_v54 }
 0x242   : > { %v468_v55 = vpop.f32.mrf.mxu1 }
 0x2b3   : > { %v473_v56 = vpop.xlane.xlu1 %472 }
 0x2b4   : > { %v474_v57 = vmul.f32 %v473_v56, %v847_v8 }
 0x2b6   : > { %v475_v58 = vsub.f32 %v470_v53, %v474_v57 }
 0x2b8   : > { %v476_v59 = vmul.f32 %v475_v58, %v475_v58 }
 0x2ba   : > { %v477_v60 = vsel %vm330_vm0, %v476_v59, 0.0 }
 0x2bb   : > { %478 = vadd.xlane.f32.xlu1 %v477_v60 }
 0x32e   : > { %v479_v61 = vpop.xlane.xlu1 %478 }
 0x32f   : > { %v480_v62 = vmul.f32 %v479_v61, %v847_v8 }
 0x331   : > { %v481_v63 = vadd.f32 1e-05, %v480_v62 }
 0x333   : > { %673 = vrsqrt.f32 %v481_v63  ;;  %vm488_vm7 = vweird.f32 %v481_v63 }
 0x339   : > { %v674_v0 = vpop.eup %673 }
 0x33a   : > { %v483_v1 = vmul.f32 %v674_v0, %v481_v63  ;;  %vm489_vm6 = vweird.f32 %v674_v0 }
 0x33b   : > { %vm490_vm8 = vmor %vm488_vm7, %vm489_vm6 }
 0x33c   : > { %v484_v2 = vmul.f32 %v674_v0, %v483_v1 }
 0x33e   : > { %v485_v3 = vmul.f32 0.5, %v484_v2 }
 0x340   : > { %v486_v4 = vsub.f32 1.5, %v485_v3 }
 0x342   : > { %v487_v5 = vmul.f32 %v674_v0, %v486_v4 }
 0x344   : > { %v491_v7 = vsel %vm490_vm8, %v674_v0, %v487_v5 }
 0x345   : > { %v492_v8 = vmul.f32 %v491_v7, %v475_v58 }
 0x347   : > { %v497_v10 = vmul.f32 %v665_v6, %v492_v8 }
 0x349   : > { %v502_v11 = vadd.f32 %v666_v9, %v497_v10 }
 0x34b   : > { %503 = vst.msk [vmem:[%s323_s17] sm:$0xff] %vm330_vm0, %v502_v11 }
 0x34c   : > { %702 = shalt.err (!%p699_p3)
}
 0x34d   : > { %621 = dma.vmem_to_hbm [thread:$0]  (%p828_p5), %s518_s13, 128, %s520_s21, %s505_s25  }
 0x34e PF: > { %p627_p4 = scmp.ge.s32.totalorder %s737_s12, 2  ;;  %s531_s22 = sand.u32 1, %s725_s30  }
 0x34f   : > { %s532_s16 = scalar_lea.sflag [#allocation3], %s531_s22 }
 0x350   : > { %p624_p7 = pnand %p627_p4, %p832_p6 }
 0x352   : > { %p625_p8 = pneg %p624_p7 }
 0x354   : > { %720 = dma.done.wait (%p625_p8), %s532_s16, 128  }
 0x355   : > { %722 = vsyncadd (%p625_p8), %s532_s16, 4294967168  ;;  %p19_p9 = scmp.ge.s32.totalorder %s815_s15, 4   ;;  %s940_s30 = smov %s729_s10 }
 0x356   : > { %s941_s10 = smov %s733_s11  ;;  %s942_s11 = smov %s826_s18 }
 0x357   : > { %s943_s12 = smov %s815_s15  ;;  %21 = sbr.rel (!%p19_p9) target bundleno = 3 (0x3), region = 91 }
 0x35c   :  { %538 = vsyncpa [#allocation3], 1 }
 0x35d   :  { %540 = vsyncpa [#allocation3 + $0x1], 1 }

</bundles_post_ra>
